<compile_context>
chip_gen: v6e
topology: v6e:2x2x1
jax: 0.10.0
libtpu: 0.0.40
codegen_flags: <defaults>
</compile_context>

<pallas_src>
import functools
import math

import numpy as np
import jax
import jax.numpy as jnp
from jax.experimental import pallas as pl
from jax.experimental.pallas import tpu as pltpu


_LN_EPS = 1e-5


def _default_vmem_limit():
    """Generation-aware scoped-VMEM limit (v5e/v6e: 128 MiB, v7x: 64 MiB/TC)."""
    try:
        cap = pltpu.get_tpu_info().vmem_capacity_bytes
        return int(min(48 * 1024 * 1024, max(16 * 1024 * 1024, 0.60 * cap)))
    except Exception:
        return 32 * 1024 * 1024          # conservative, safe on every generation


_VMEM_LIMIT = _default_vmem_limit()


def _layer_norm(y, g, b):
    """f32 LayerNorm over the last dim. g/b broadcast from (1, D)."""
    mu = jnp.mean(y, axis=-1, keepdims=True)
    yc = y - mu
    var = jnp.mean(yc * yc, axis=-1, keepdims=True)
    return yc * jax.lax.rsqrt(var + _LN_EPS) * g + b


# ---------------- fused transformer layer (one pallas_call / layer) ----------
# QKV proj + MHA + out-proj + residual + LN1 + FFN + residual + LN2.

def _layer_kernel(x_ref, wqkv_ref, bqkv_ref, wo_ref, bo_ref,
                  g1_ref, b1_ref, w1_ref, bf1_ref, w2_ref, bf2_ref,
                  g2_ref, b2_ref, o_ref, *, num_heads):
    x = x_ref[0]                                     # (T, D) f32
    T, D = x.shape
    dh = D // num_heads
    scale = 1.0 / math.sqrt(dh)

    # ---- fused QKV projection: bf16 operands, f32 accumulation ----
    qkv = jnp.dot(x.astype(jnp.bfloat16), wqkv_ref[...],
                  preferred_element_type=jnp.float32) + bqkv_ref[...]   # (T, 3D)

    # ---- per-head attention (unrolled; H is small), heads concatenated along
    #      lanes, then a single full-width out-projection matmul ----
    heads = []
    for h in range(num_heads):
        qh = qkv[:, h * dh:(h + 1) * dh]                         # (T, dh)
        kh = qkv[:, D + h * dh:D + (h + 1) * dh]
        vh = qkv[:, 2 * D + h * dh:2 * D + (h + 1) * dh]
        # scores: contract last dims directly (no explicit transpose)
        s = jax.lax.dot_general(qh, kh, (((1,), (1,)), ((), ())),
                                preferred_element_type=jnp.float32) * scale
        s = s - jnp.max(s, axis=-1, keepdims=True)
        p = jnp.exp(s)
        p = p * pl.reciprocal(jnp.sum(p, axis=-1, keepdims=True), approx=True)
        heads.append(jnp.dot(p, vh, preferred_element_type=jnp.float32))
    o_cat = jnp.concatenate(heads, axis=-1)                      # (T, D)
    attn = jnp.dot(o_cat.astype(jnp.bfloat16), wo_ref[...],
                   preferred_element_type=jnp.float32) + bo_ref[...]

    # ---- residual + LayerNorm 1 (f32) ----
    y = _layer_norm(x + attn, g1_ref[...], b1_ref[...])

    # ---- FFN: bf16 matmuls, f32 accumulation + f32 elementwise ----
    h1 = jnp.dot(y.astype(jnp.bfloat16), w1_ref[...],
                 preferred_element_type=jnp.float32) + bf1_ref[...]
    h1 = jnp.maximum(h1, 0.0)
    z = jnp.dot(h1.astype(jnp.bfloat16), w2_ref[...],
                preferred_element_type=jnp.float32) + bf2_ref[...]

    # ---- residual + LayerNorm 2 (f32) ----
    o_ref[0] = _layer_norm(y + z, g2_ref[...], b2_ref[...])


def _transformer_layer(x, p, num_heads):
    B, T, D = x.shape
    F = p["ff1_w"].shape[1]
    bf16 = jnp.bfloat16
    kern = functools.partial(_layer_kernel, num_heads=num_heads)

    def wspec(shape):
        return pl.BlockSpec(shape, lambda b: (0,) * len(shape))

    return pl.pallas_call(
        kern,
        out_shape=jax.ShapeDtypeStruct((B, T, D), jnp.float32),
        grid=(B,),
        in_specs=[
            pl.BlockSpec((1, T, D), lambda b: (b, 0, 0)),   # activations
            wspec((D, 3 * D)), wspec((1, 3 * D)),            # qkv
            wspec((D, D)), wspec((1, D)),                    # out proj
            wspec((1, D)), wspec((1, D)),                    # ln1
            wspec((D, F)), wspec((1, F)),                    # ff1
            wspec((F, D)), wspec((1, D)),                    # ff2
            wspec((1, D)), wspec((1, D)),                    # ln2
        ],
        out_specs=pl.BlockSpec((1, T, D), lambda b: (b, 0, 0)),
        compiler_params=pltpu.CompilerParams(
            dimension_semantics=("parallel",),
            vmem_limit_bytes=_VMEM_LIMIT),
    )(x,
      p["qkv_w"].astype(bf16), p["qkv_b"].reshape(1, 3 * D),
      p["out_w"].astype(bf16), p["out_b"].reshape(1, D),
      p["ln1_g"].reshape(1, D), p["ln1_b"].reshape(1, D),
      p["ff1_w"].astype(bf16), p["ff1_b"].reshape(1, F),
      p["ff2_w"].astype(bf16), p["ff2_b"].reshape(1, D),
      p["ln2_g"].reshape(1, D), p["ln2_b"].reshape(1, D))


# -------------- fused decoder_norm + decoder_pred (lane-dense out) -----------

def _norm_pred_kernel(x_ref, g_ref, b_ref, w_ref, wb_ref, o_ref):
    x = x_ref[0]                                     # (T, D) f32
    xn = _layer_norm(x, g_ref[...], b_ref[...])
    o_ref[0] = jnp.dot(xn.astype(jnp.bfloat16), w_ref[...],
                       preferred_element_type=jnp.float32) + wb_ref[...]


def _norm_pred(x, g, b, w, wb):
    B, T, D = x.shape
    N = w.shape[1]
    Npad = ((N + 127) // 128) * 128          # lane-dense output (unmasked vst)
    w_p = jnp.pad(w, ((0, 0), (0, Npad - N))).astype(jnp.bfloat16)
    wb_p = jnp.pad(wb, ((0, Npad - N),)).reshape(1, Npad)
    return pl.pallas_call(
        _norm_pred_kernel,
        out_shape=jax.ShapeDtypeStruct((B, T, Npad), jnp.float32),
        grid=(B,),
        in_specs=[
            pl.BlockSpec((1, T, D), lambda i: (i, 0, 0)),
            pl.BlockSpec((1, D), lambda i: (0, 0)),
            pl.BlockSpec((1, D), lambda i: (0, 0)),
            pl.BlockSpec((D, Npad), lambda i: (0, 0)),
            pl.BlockSpec((1, Npad), lambda i: (0, 0)),
        ],
        out_specs=pl.BlockSpec((1, T, Npad), lambda i: (i, 0, 0)),
        compiler_params=pltpu.CompilerParams(
            dimension_semantics=("parallel",),
            vmem_limit_bytes=_VMEM_LIMIT),
    )(x, g.reshape(1, D), b.reshape(1, D), w_p, wb_p)


# ------------------------------ model pieces --------------------------------

def _sinusoidal_pos_embed(max_len, d):
    pos = np.arange(max_len, dtype=np.float32)[:, None]
    div = np.exp(np.arange(0, d, 2, dtype=np.float32) * (-math.log(10000.0) / d))
    pe = np.zeros((max_len, d), np.float32)
    pe[:, 0::2] = np.sin(pos * div)
    pe[:, 1::2] = np.cos(pos * div)
    return jnp.asarray(pe)


def mem_head_forward(params, x, ids_restore, *, num_heads, decoded_size):
    B, n_vis, hidden = x.shape
    L = ids_restore.shape[1]
    D = params["embed_w"].shape[1]

    # decoder_embed + mask-token unshuffle + positional encoding: plain JAX.
    # (Per perf review: a standalone pallas_call at M=B*n_vis is pure launch
    #  overhead; the ids_restore gather is data-dependent glue.)
    # TODO(synk): fuse embed + gather + PE into the first layer kernel via
    # PrefetchScalarGridSpec once shapes are large enough to matter.
    x = (jnp.dot(x.reshape(B * n_vis, hidden), params["embed_w"])
         + params["embed_b"]).reshape(B, n_vis, D)

    n_mask = L + 1 - n_vis
    mask_tokens = jnp.broadcast_to(params["mask_token"], (B, n_mask, D))
    x_ = jnp.concatenate([x[:, 1:, :], mask_tokens], axis=1)            # (B, L, D)
    idx = jnp.broadcast_to(ids_restore[:, :, None].astype(jnp.int32), (B, L, D))
    x_ = jnp.take_along_axis(x_, idx, axis=1)
    x = jnp.concatenate([x[:, :1, :], x_], axis=1)                      # (B, L+1, D)

    T = L + 1
    x = x + params["pos_embed"][None, :T, :]

    # transformer body: one fused pallas_call per layer, kept in (B, T, D)
    # layout (the PyTorch permute(1,0,2) is layout-only).
    for layer in params["layers"]:
        x = _transformer_layer(x, layer, num_heads)

    # decoder_norm + decoder_pred fused; padded lanes sliced off here.
    out_dim = params["pred_w"].shape[1]
    y = _norm_pred(x, params["norm_g"], params["norm_b"],
                   params["pred_w"], params["pred_b"])
    y = y[:, 1:, :out_dim]                          # drop cls token + lane pad
    return y.reshape(B, L, -1, decoded_size)


# ------------------------------- param init ---------------------------------

def init_params(key, hidden_dim, dec_dim, num_layers, pred_out_dim, max_len=512):
    n_dec_layers = num_layers + 1
    keys = jax.random.split(key, 4 + n_dec_layers)

    def lin(k, fi, fo):
        return (jax.random.normal(k, (fi, fo), jnp.float32) * 0.02,
                jnp.zeros((fo,), jnp.float32))

    embed_w, embed_b = lin(keys[0], hidden_dim, dec_dim)
    mask_token = jax.random.normal(keys[1], (1, 1, dec_dim), jnp.float32) * 0.02
    pred_w, pred_b = lin(keys[2], dec_dim, pred_out_dim)

    ffn = 4 * dec_dim
    layers = []
    for i in range(n_dec_layers):
        lk = jax.random.split(keys[4 + i], 4)
        qkv_w, qkv_b = lin(lk[0], dec_dim, 3 * dec_dim)
        out_w, out_b = lin(lk[1], dec_dim, dec_dim)
        ff1_w, ff1_b = lin(lk[2], dec_dim, ffn)
        ff2_w, ff2_b = lin(lk[3], ffn, dec_dim)
        layers.append(dict(
            qkv_w=qkv_w, qkv_b=qkv_b, out_w=out_w, out_b=out_b,
            ff1_w=ff1_w, ff1_b=ff1_b, ff2_w=ff2_w, ff2_b=ff2_b,
            ln1_g=jnp.ones((dec_dim,), jnp.float32),
            ln1_b=jnp.zeros((dec_dim,), jnp.float32),
            ln2_g=jnp.ones((dec_dim,), jnp.float32),
            ln2_b=jnp.zeros((dec_dim,), jnp.float32),
        ))

    return dict(
        embed_w=embed_w, embed_b=embed_b,
        mask_token=mask_token,
        pos_embed=_sinusoidal_pos_embed(max_len, dec_dim),
        layers=layers,
        norm_g=jnp.ones((dec_dim,), jnp.float32),
        norm_b=jnp.zeros((dec_dim,), jnp.float32),
        pred_w=pred_w, pred_b=pred_b,
    )


# ---------------------------------- main -------------------------------------

if __name__ == "__main__":
    # synthetic cfg
    HIDDEN_DIM = 32
    DEC_DIM = 32
    NUM_LAYERS = 1           # transformer gets NUM_LAYERS + 1 = 2 layers
    NUM_HEADS = 4
    CONV_FEATURE_LAYERS = "[(512, 4, 4), (512, 2, 2)]"

    # mirror the module's inferred_decoded_size computation
    conv_cfg = eval(CONV_FEATURE_LAYERS)
    length = 5000.0
    for (_, ksz, st) in conv_cfg:
        length = np.floor((length - ksz) / st + 1)
    decoded_size = int(np.floor(5000 / length))          # -> 8
    pred_out_dim = decoded_size * 12                     # -> 96

    B, n_vis, L = 2, 5, 8     # x has 1 cls + 4 visible tokens; 8 total patches

    key = jax.random.PRNGKey(0)
    kx, kr, kp = jax.random.split(key, 3)
    x = jax.random.normal(kx, (B, n_vis, HIDDEN_DIM), jnp.float32)
    ids_restore = jnp.stack(
        [jax.random.permutation(jax.random.fold_in(kr, b), L) for b in range(B)]
    ).astype(jnp.int32)

    params = init_params(kp, HIDDEN_DIM, DEC_DIM, NUM_LAYERS, pred_out_dim)
    assert params["pos_embed"].shape[0] >= L + 1

    fwd = jax.jit(functools.partial(
        mem_head_forward, num_heads=NUM_HEADS, decoded_size=decoded_size))

    out = fwd(params, x, ids_restore)
    out = jax.block_until_ready(out)
    assert out.shape == (B, L, 12, decoded_size), out.shape
    assert out.dtype == jnp.float32
    assert bool(jnp.all(jnp.isfinite(out)))
    print("KERNEL_OK")
</pallas_src>

<mosaic_0001>
module attributes {stable_mosaic.version = 11 : i64} {
  func.func @_norm_pred_kernel(%arg0: i32, %arg1: memref<1x9x32xf32, #tpu.memory_space<vmem>>, %arg2: memref<1x32xf32, #tpu.memory_space<vmem>>, %arg3: memref<1x32xf32, #tpu.memory_space<vmem>>, %arg4: memref<32x128xbf16, #tpu.memory_space<vmem>>, %arg5: memref<1x128xf32, #tpu.memory_space<vmem>>, %arg6: memref<1x9x128xf32, #tpu.memory_space<vmem>>) attributes {dimension_semantics = [#tpu.dimension_semantics<parallel>], iteration_bounds = array<i64: 2>, scalar_prefetch = 0 : i64, scratch_operands = 0 : i64, tpu.core_type = #tpu.core_type<tc>, window_params = [{transform_indices = @transform_0, window_bounds = array<i64: 1, 9, 32>}, {pipeline_mode = #tpu.pipeline_mode<synchronous>, transform_indices = @transform_1, window_bounds = array<i64: 1, 32>}, {pipeline_mode = #tpu.pipeline_mode<synchronous>, transform_indices = @transform_2, window_bounds = array<i64: 1, 32>}, {pipeline_mode = #tpu.pipeline_mode<synchronous>, transform_indices = @transform_3, window_bounds = array<i64: 32, 128>}, {pipeline_mode = #tpu.pipeline_mode<synchronous>, transform_indices = @transform_4, window_bounds = array<i64: 1, 128>}, {transform_indices = @transform_5, window_bounds = array<i64: 1, 9, 128>}]} {
    %c0 = arith.constant 0 : index
    %c0_0 = arith.constant 0 : index
    %c0_1 = arith.constant 0 : index
    %0 = vector.load %arg1[%c0, %c0_0, %c0_1] : memref<1x9x32xf32, #tpu.memory_space<vmem>>, vector<1x9x32xf32>
    %1 = vector.shape_cast %0 : vector<1x9x32xf32> to vector<9x32xf32>
    %c0_2 = arith.constant 0 : index
    %c0_3 = arith.constant 0 : index
    %2 = vector.load %arg2[%c0_2, %c0_3] : memref<1x32xf32, #tpu.memory_space<vmem>>, vector<1x32xf32>
    %c0_4 = arith.constant 0 : index
    %c0_5 = arith.constant 0 : index
    %3 = vector.load %arg3[%c0_4, %c0_5] : memref<1x32xf32, #tpu.memory_space<vmem>>, vector<1x32xf32>
    %cst = arith.constant dense<0.000000e+00> : vector<9xf32>
    %4 = vector.multi_reduction <add>, %1, %cst [1] : vector<9x32xf32> to vector<9xf32>
    %5 = vector.shape_cast %4 : vector<9xf32> to vector<9x1xf32>
    %cst_6 = arith.constant 3.200000e+01 : f32
    %6 = vector.broadcast %cst_6 : f32 to vector<9x1xf32>
    %7 = arith.divf %5, %6 : vector<9x1xf32>
    %8 = vector.broadcast %7 : vector<9x1xf32> to vector<9x32xf32>
    %9 = arith.subf %1, %8 : vector<9x32xf32>
    %10 = arith.mulf %9, %9 : vector<9x32xf32>
    %cst_7 = arith.constant dense<0.000000e+00> : vector<9xf32>
    %11 = vector.multi_reduction <add>, %10, %cst_7 [1] : vector<9x32xf32> to vector<9xf32>
    %12 = vector.shape_cast %11 : vector<9xf32> to vector<9x1xf32>
    %cst_8 = arith.constant 3.200000e+01 : f32
    %13 = vector.broadcast %cst_8 : f32 to vector<9x1xf32>
    %14 = arith.divf %12, %13 : vector<9x1xf32>
    %cst_9 = arith.constant 9.99999974E-6 : f32
    %15 = vector.broadcast %cst_9 : f32 to vector<9x1xf32>
    %16 = arith.addf %14, %15 : vector<9x1xf32>
    %17 = math.rsqrt %16 : vector<9x1xf32>
    %18 = vector.broadcast %17 : vector<9x1xf32> to vector<9x32xf32>
    %19 = arith.mulf %9, %18 : vector<9x32xf32>
    %20 = vector.broadcast %2 : vector<1x32xf32> to vector<9x32xf32>
    %21 = arith.mulf %19, %20 : vector<9x32xf32>
    %22 = vector.broadcast %3 : vector<1x32xf32> to vector<9x32xf32>
    %23 = arith.addf %21, %22 : vector<9x32xf32>
    %24 = arith.truncf %23 : vector<9x32xf32> to vector<9x32xbf16>
    %c0_10 = arith.constant 0 : index
    %c0_11 = arith.constant 0 : index
    %25 = vector.load %arg4[%c0_10, %c0_11] : memref<32x128xbf16, #tpu.memory_space<vmem>>, vector<32x128xbf16>
    %cst_12 = arith.constant dense<0.000000e+00> : vector<9x128xf32>
    %26 = tpu.matmul %24, %25, %cst_12 {dimension_numbers = #tpu.dot_dimension_numbers<[1], [0], [0], [1], [0, 0, 1, 1], [], []>} : vector<9x32xbf16>, vector<32x128xbf16>, vector<9x128xf32> -> vector<9x128xf32>
    %c0_13 = arith.constant 0 : index
    %c0_14 = arith.constant 0 : index
    %27 = vector.load %arg5[%c0_13, %c0_14] : memref<1x128xf32, #tpu.memory_space<vmem>>, vector<1x128xf32>
    %28 = vector.broadcast %27 : vector<1x128xf32> to vector<9x128xf32>
    %29 = arith.addf %26, %28 : vector<9x128xf32>
    %c0_15 = arith.constant 0 : index
    %c0_16 = arith.constant 0 : index
    %c0_17 = arith.constant 0 : index
    %30 = vector.load %arg6[%c0_15, %c0_16, %c0_17] : memref<1x9x128xf32, #tpu.memory_space<vmem>>, vector<1x9x128xf32>
    %31 = vector.shape_cast %30 : vector<1x9x128xf32> to vector<9x128xf32>
    %32 = vector.shape_cast %29 : vector<9x128xf32> to vector<1x9x128xf32>
    tpu.vector_store %arg6[%c0_15, %c0_16, %c0_17], %32 {strides = array<i32>} : memref<1x9x128xf32, #tpu.memory_space<vmem>>, vector<1x9x128xf32>,
    return
  }
  func.func @transform_0(%arg0: i32) -> (i32, i32, i32) {
    %c0_i32 = arith.constant 0 : i32
    %c0_i32_0 = arith.constant 0 : i32
    %c0_i32_1 = arith.constant 0 : i32
    return %arg0, %c0_i32, %c0_i32_0 : i32, i32, i32
  }
  func.func @transform_1(%arg0: i32) -> (i32, i32) {
    %c0_i32 = arith.constant 0 : i32
    %c0_i32_0 = arith.constant 0 : i32
    %c0_i32_1 = arith.constant 0 : i32
    return %c0_i32, %c0_i32_0 : i32, i32
  }
  func.func @transform_2(%arg0: i32) -> (i32, i32) {
    %c0_i32 = arith.constant 0 : i32
    %c0_i32_0 = arith.constant 0 : i32
    %c0_i32_1 = arith.constant 0 : i32
    return %c0_i32, %c0_i32_0 : i32, i32
  }
  func.func @transform_3(%arg0: i32) -> (i32, i32) {
    %c0_i32 = arith.constant 0 : i32
    %c0_i32_0 = arith.constant 0 : i32
    %c0_i32_1 = arith.constant 0 : i32
    return %c0_i32, %c0_i32_0 : i32, i32
  }
  func.func @transform_4(%arg0: i32) -> (i32, i32) {
    %c0_i32 = arith.constant 0 : i32
    %c0_i32_0 = arith.constant 0 : i32
    %c0_i32_1 = arith.constant 0 : i32
    return %c0_i32, %c0_i32_0 : i32, i32
  }
  func.func @transform_5(%arg0: i32) -> (i32, i32, i32) {
    %c0_i32 = arith.constant 0 : i32
    %c0_i32_0 = arith.constant 0 : i32
    %c0_i32_1 = arith.constant 0 : i32
    return %arg0, %c0_i32, %c0_i32_0 : i32, i32, i32
  }
}

module attributes {stable_mosaic.version = 11 : i64} {
  func.func @_layer_kernel(%arg0: i32, %arg1: memref<1x9x32xf32, #tpu.memory_space<vmem>>, %arg2: memref<32x96xbf16, #tpu.memory_space<vmem>>, %arg3: memref<1x96xf32, #tpu.memory_space<vmem>>, %arg4: memref<32x32xbf16, #tpu.memory_space<vmem>>, %arg5: memref<1x32xf32, #tpu.memory_space<vmem>>, %arg6: memref<1x32xf32, #tpu.memory_space<vmem>>, %arg7: memref<1x32xf32, #tpu.memory_space<vmem>>, %arg8: memref<32x128xbf16, #tpu.memory_space<vmem>>, %arg9: memref<1x128xf32, #tpu.memory_space<vmem>>, %arg10: memref<128x32xbf16, #tpu.memory_space<vmem>>, %arg11: memref<1x32xf32, #tpu.memory_space<vmem>>, %arg12: memref<1x32xf32, #tpu.memory_space<vmem>>, %arg13: memref<1x32xf32, #tpu.memory_space<vmem>>, %arg14: memref<1x9x32xf32, #tpu.memory_space<vmem>>) attributes {dimension_semantics = [#tpu.dimension_semantics<parallel>], iteration_bounds = array<i64: 2>, scalar_prefetch = 0 : i64, scratch_operands = 0 : i64, tpu.core_type = #tpu.core_type<tc>, window_params = [{transform_indices = @transform_0, window_bounds = array<i64: 1, 9, 32>}, {pipeline_mode = #tpu.pipeline_mode<synchronous>, transform_indices = @transform_1, window_bounds = array<i64: 32, 96>}, {pipeline_mode = #tpu.pipeline_mode<synchronous>, transform_indices = @transform_2, window_bounds = array<i64: 1, 96>}, {pipeline_mode = #tpu.pipeline_mode<synchronous>, transform_indices = @transform_3, window_bounds = array<i64: 32, 32>}, {pipeline_mode = #tpu.pipeline_mode<synchronous>, transform_indices = @transform_4, window_bounds = array<i64: 1, 32>}, {pipeline_mode = #tpu.pipeline_mode<synchronous>, transform_indices = @transform_5, window_bounds = array<i64: 1, 32>}, {pipeline_mode = #tpu.pipeline_mode<synchronous>, transform_indices = @transform_6, window_bounds = array<i64: 1, 32>}, {pipeline_mode = #tpu.pipeline_mode<synchronous>, transform_indices = @transform_7, window_bounds = array<i64: 32, 128>}, {pipeline_mode = #tpu.pipeline_mode<synchronous>, transform_indices = @transform_8, window_bounds = array<i64: 1, 128>}, {pipeline_mode = #tpu.pipeline_mode<synchronous>, transform_indices = @transform_9, window_bounds = array<i64: 128, 32>}, {pipeline_mode = #tpu.pipeline_mode<synchronous>, transform_indices = @transform_10, window_bounds = array<i64: 1, 32>}, {pipeline_mode = #tpu.pipeline_mode<synchronous>, transform_indices = @transform_11, window_bounds = array<i64: 1, 32>}, {pipeline_mode = #tpu.pipeline_mode<synchronous>, transform_indices = @transform_12, window_bounds = array<i64: 1, 32>}, {transform_indices = @transform_13, window_bounds = array<i64: 1, 9, 32>}]} {
    %c0 = arith.constant 0 : index
    %c0_0 = arith.constant 0 : index
    %c0_1 = arith.constant 0 : index
    %0 = vector.load %arg1[%c0, %c0_0, %c0_1] : memref<1x9x32xf32, #tpu.memory_space<vmem>>, vector<1x9x32xf32>
    %1 = vector.shape_cast %0 : vector<1x9x32xf32> to vector<9x32xf32>
    %2 = arith.truncf %1 : vector<9x32xf32> to vector<9x32xbf16>
    %c0_2 = arith.constant 0 : index
    %c0_3 = arith.constant 0 : index
    %3 = vector.load %arg2[%c0_2, %c0_3] : memref<32x96xbf16, #tpu.memory_space<vmem>>, vector<32x96xbf16>
    %cst = arith.constant dense<0.000000e+00> : vector<9x96xf32>
    %4 = tpu.matmul %2, %3, %cst {dimension_numbers = #tpu.dot_dimension_numbers<[1], [0], [0], [1], [0, 0, 1, 1], [], []>} : vector<9x32xbf16>, vector<32x96xbf16>, vector<9x96xf32> -> vector<9x96xf32>
    %c0_4 = arith.constant 0 : index
    %c0_5 = arith.constant 0 : index
    %5 = vector.load %arg3[%c0_4, %c0_5] : memref<1x96xf32, #tpu.memory_space<vmem>>, vector<1x96xf32>
    %6 = vector.broadcast %5 : vector<1x96xf32> to vector<9x96xf32>
    %7 = arith.addf %4, %6 : vector<9x96xf32>
    %8 = vector.extract_strided_slice %7 {offsets = [0, 0], sizes = [9, 8], strides = [1, 1]} : vector<9x96xf32> to vector<9x8xf32>
    %9 = vector.extract_strided_slice %7 {offsets = [0, 32], sizes = [9, 8], strides = [1, 1]} : vector<9x96xf32> to vector<9x8xf32>
    %10 = vector.extract_strided_slice %7 {offsets = [0, 64], sizes = [9, 8], strides = [1, 1]} : vector<9x96xf32> to vector<9x8xf32>
    %cst_6 = arith.constant dense<0.000000e+00> : vector<9x9xf32>
    %11 = tpu.matmul %8, %9, %cst_6 {dimension_numbers = #tpu.dot_dimension_numbers<[1], [1], [0], [0], [0, 0, 1, 0], [], []>} : vector<9x8xf32>, vector<9x8xf32>, vector<9x9xf32> -> vector<9x9xf32>
    %cst_7 = arith.constant 0.353553385 : f32
    %12 = vector.broadcast %cst_7 : f32 to vector<9x9xf32>
    %13 = arith.mulf %11, %12 : vector<9x9xf32>
    %cst_8 = arith.constant dense<0xFF800000> : vector<9xf32>
    %14 = vector.multi_reduction <maximumf>, %13, %cst_8 [1] : vector<9x9xf32> to vector<9xf32>
    %15 = vector.shape_cast %14 : vector<9xf32> to vector<9x1xf32>
    %16 = vector.broadcast %15 : vector<9x1xf32> to vector<9x9xf32>
    %17 = arith.subf %13, %16 : vector<9x9xf32>
    %18 = math.exp %17 : vector<9x9xf32>
    %cst_9 = arith.constant dense<0.000000e+00> : vector<9xf32>
    %19 = vector.multi_reduction <add>, %18, %cst_9 [1] : vector<9x9xf32> to vector<9xf32>
    %20 = vector.shape_cast %19 : vector<9xf32> to vector<9x1xf32>
    %21 = tpu.reciprocal %20 {approx = true} : vector<9x1xf32> -> vector<9x1xf32>
    %22 = vector.broadcast %21 : vector<9x1xf32> to vector<9x9xf32>
    %23 = arith.mulf %18, %22 : vector<9x9xf32>
    %cst_10 = arith.constant dense<0.000000e+00> : vector<9x8xf32>
    %24 = tpu.matmul %23, %10, %cst_10 {dimension_numbers = #tpu.dot_dimension_numbers<[1], [0], [0], [1], [0, 0, 1, 1], [], []>} : vector<9x9xf32>, vector<9x8xf32>, vector<9x8xf32> -> vector<9x8xf32>
    %25 = vector.extract_strided_slice %7 {offsets = [0, 8], sizes = [9, 8], strides = [1, 1]} : vector<9x96xf32> to vector<9x8xf32>
    %26 = vector.extract_strided_slice %7 {offsets = [0, 40], sizes = [9, 8], strides = [1, 1]} : vector<9x96xf32> to vector<9x8xf32>
    %27 = vector.extract_strided_slice %7 {offsets = [0, 72], sizes = [9, 8], strides = [1, 1]} : vector<9x96xf32> to vector<9x8xf32>
    %cst_11 = arith.constant dense<0.000000e+00> : vector<9x9xf32>
    %28 = tpu.matmul %25, %26, %cst_11 {dimension_numbers = #tpu.dot_dimension_numbers<[1], [1], [0], [0], [0, 0, 1, 0], [], []>} : vector<9x8xf32>, vector<9x8xf32>, vector<9x9xf32> -> vector<9x9xf32>
    %cst_12 = arith.constant 0.353553385 : f32
    %29 = vector.broadcast %cst_12 : f32 to vector<9x9xf32>
    %30 = arith.mulf %28, %29 : vector<9x9xf32>
    %cst_13 = arith.constant dense<0xFF800000> : vector<9xf32>
    %31 = vector.multi_reduction <maximumf>, %30, %cst_13 [1] : vector<9x9xf32> to vector<9xf32>
    %32 = vector.shape_cast %31 : vector<9xf32> to vector<9x1xf32>
    %33 = vector.broadcast %32 : vector<9x1xf32> to vector<9x9xf32>
    %34 = arith.subf %30, %33 : vector<9x9xf32>
    %35 = math.exp %34 : vector<9x9xf32>
    %cst_14 = arith.constant dense<0.000000e+00> : vector<9xf32>
    %36 = vector.multi_reduction <add>, %35, %cst_14 [1] : vector<9x9xf32> to vector<9xf32>
    %37 = vector.shape_cast %36 : vector<9xf32> to vector<9x1xf32>
    %38 = tpu.reciprocal %37 {approx = true} : vector<9x1xf32> -> vector<9x1xf32>
    %39 = vector.broadcast %38 : vector<9x1xf32> to vector<9x9xf32>
    %40 = arith.mulf %35, %39 : vector<9x9xf32>
    %cst_15 = arith.constant dense<0.000000e+00> : vector<9x8xf32>
    %41 = tpu.matmul %40, %27, %cst_15 {dimension_numbers = #tpu.dot_dimension_numbers<[1], [0], [0], [1], [0, 0, 1, 1], [], []>} : vector<9x9xf32>, vector<9x8xf32>, vector<9x8xf32> -> vector<9x8xf32>
    %42 = vector.extract_strided_slice %7 {offsets = [0, 16], sizes = [9, 8], strides = [1, 1]} : vector<9x96xf32> to vector<9x8xf32>
    %43 = vector.extract_strided_slice %7 {offsets = [0, 48], sizes = [9, 8], strides = [1, 1]} : vector<9x96xf32> to vector<9x8xf32>
    %44 = vector.extract_strided_slice %7 {offsets = [0, 80], sizes = [9, 8], strides = [1, 1]} : vector<9x96xf32> to vector<9x8xf32>
    %cst_16 = arith.constant dense<0.000000e+00> : vector<9x9xf32>
    %45 = tpu.matmul %42, %43, %cst_16 {dimension_numbers = #tpu.dot_dimension_numbers<[1], [1], [0], [0], [0, 0, 1, 0], [], []>} : vector<9x8xf32>, vector<9x8xf32>, vector<9x9xf32> -> vector<9x9xf32>
    %cst_17 = arith.constant 0.353553385 : f32
    %46 = vector.broadcast %cst_17 : f32 to vector<9x9xf32>
    %47 = arith.mulf %45, %46 : vector<9x9xf32>
    %cst_18 = arith.constant dense<0xFF800000> : vector<9xf32>
    %48 = vector.multi_reduction <maximumf>, %47, %cst_18 [1] : vector<9x9xf32> to vector<9xf32>
    %49 = vector.shape_cast %48 : vector<9xf32> to vector<9x1xf32>
    %50 = vector.broadcast %49 : vector<9x1xf32> to vector<9x9xf32>
    %51 = arith.subf %47, %50 : vector<9x9xf32>
    %52 = math.exp %51 : vector<9x9xf32>
    %cst_19 = arith.constant dense<0.000000e+00> : vector<9xf32>
    %53 = vector.multi_reduction <add>, %52, %cst_19 [1] : vector<9x9xf32> to vector<9xf32>
    %54 = vector.shape_cast %53 : vector<9xf32> to vector<9x1xf32>
    %55 = tpu.reciprocal %54 {approx = true} : vector<9x1xf32> -> vector<9x1xf32>
    %56 = vector.broadcast %55 : vector<9x1xf32> to vector<9x9xf32>
    %57 = arith.mulf %52, %56 : vector<9x9xf32>
    %cst_20 = arith.constant dense<0.000000e+00> : vector<9x8xf32>
    %58 = tpu.matmul %57, %44, %cst_20 {dimension_numbers = #tpu.dot_dimension_numbers<[1], [0], [0], [1], [0, 0, 1, 1], [], []>} : vector<9x9xf32>, vector<9x8xf32>, vector<9x8xf32> -> vector<9x8xf32>
    %59 = vector.extract_strided_slice %7 {offsets = [0, 24], sizes = [9, 8], strides = [1, 1]} : vector<9x96xf32> to vector<9x8xf32>
    %60 = vector.extract_strided_slice %7 {offsets = [0, 56], sizes = [9, 8], strides = [1, 1]} : vector<9x96xf32> to vector<9x8xf32>
    %61 = vector.extract_strided_slice %7 {offsets = [0, 88], sizes = [9, 8], strides = [1, 1]} : vector<9x96xf32> to vector<9x8xf32>
    %cst_21 = arith.constant dense<0.000000e+00> : vector<9x9xf32>
    %62 = tpu.matmul %59, %60, %cst_21 {dimension_numbers = #tpu.dot_dimension_numbers<[1], [1], [0], [0], [0, 0, 1, 0], [], []>} : vector<9x8xf32>, vector<9x8xf32>, vector<9x9xf32> -> vector<9x9xf32>
    %cst_22 = arith.constant 0.353553385 : f32
    %63 = vector.broadcast %cst_22 : f32 to vector<9x9xf32>
    %64 = arith.mulf %62, %63 : vector<9x9xf32>
    %cst_23 = arith.constant dense<0xFF800000> : vector<9xf32>
    %65 = vector.multi_reduction <maximumf>, %64, %cst_23 [1] : vector<9x9xf32> to vector<9xf32>
    %66 = vector.shape_cast %65 : vector<9xf32> to vector<9x1xf32>
    %67 = vector.broadcast %66 : vector<9x1xf32> to vector<9x9xf32>
    %68 = arith.subf %64, %67 : vector<9x9xf32>
    %69 = math.exp %68 : vector<9x9xf32>
    %cst_24 = arith.constant dense<0.000000e+00> : vector<9xf32>
    %70 = vector.multi_reduction <add>, %69, %cst_24 [1] : vector<9x9xf32> to vector<9xf32>
    %71 = vector.shape_cast %70 : vector<9xf32> to vector<9x1xf32>
    %72 = tpu.reciprocal %71 {approx = true} : vector<9x1xf32> -> vector<9x1xf32>
    %73 = vector.broadcast %72 : vector<9x1xf32> to vector<9x9xf32>
    %74 = arith.mulf %69, %73 : vector<9x9xf32>
    %cst_25 = arith.constant dense<0.000000e+00> : vector<9x8xf32>
    %75 = tpu.matmul %74, %61, %cst_25 {dimension_numbers = #tpu.dot_dimension_numbers<[1], [0], [0], [1], [0, 0, 1, 1], [], []>} : vector<9x9xf32>, vector<9x8xf32>, vector<9x8xf32> -> vector<9x8xf32>
    %76 = tpu.concatenate %24, %41, %58, %75 in 1 : vector<9x8xf32>, vector<9x8xf32>, vector<9x8xf32>, vector<9x8xf32> -> vector<9x32xf32>
    %77 = arith.truncf %76 : vector<9x32xf32> to vector<9x32xbf16>
    %c0_26 = arith.constant 0 : index
    %c0_27 = arith.constant 0 : index
    %78 = vector.load %arg4[%c0_26, %c0_27] : memref<32x32xbf16, #tpu.memory_space<vmem>>, vector<32x32xbf16>
    %cst_28 = arith.constant dense<0.000000e+00> : vector<9x32xf32>
    %79 = tpu.matmul %77, %78, %cst_28 {dimension_numbers = #tpu.dot_dimension_numbers<[1], [0], [0], [1], [0, 0, 1, 1], [], []>} : vector<9x32xbf16>, vector<32x32xbf16>, vector<9x32xf32> -> vector<9x32xf32>
    %c0_29 = arith.constant 0 : index
    %c0_30 = arith.constant 0 : index
    %80 = vector.load %arg5[%c0_29, %c0_30] : memref<1x32xf32, #tpu.memory_space<vmem>>, vector<1x32xf32>
    %81 = vector.broadcast %80 : vector<1x32xf32> to vector<9x32xf32>
    %82 = arith.addf %79, %81 : vector<9x32xf32>
    %83 = arith.addf %1, %82 : vector<9x32xf32>
    %c0_31 = arith.constant 0 : index
    %c0_32 = arith.constant 0 : index
    %84 = vector.load %arg6[%c0_31, %c0_32] : memref<1x32xf32, #tpu.memory_space<vmem>>, vector<1x32xf32>
    %c0_33 = arith.constant 0 : index
    %c0_34 = arith.constant 0 : index
    %85 = vector.load %arg7[%c0_33, %c0_34] : memref<1x32xf32, #tpu.memory_space<vmem>>, vector<1x32xf32>
    %cst_35 = arith.constant dense<0.000000e+00> : vector<9xf32>
    %86 = vector.multi_reduction <add>, %83, %cst_35 [1] : vector<9x32xf32> to vector<9xf32>
    %87 = vector.shape_cast %86 : vector<9xf32> to vector<9x1xf32>
    %cst_36 = arith.constant 3.200000e+01 : f32
    %88 = vector.broadcast %cst_36 : f32 to vector<9x1xf32>
    %89 = arith.divf %87, %88 : vector<9x1xf32>
    %90 = vector.broadcast %89 : vector<9x1xf32> to vector<9x32xf32>
    %91 = arith.subf %83, %90 : vector<9x32xf32>
    %92 = arith.mulf %91, %91 : vector<9x32xf32>
    %cst_37 = arith.constant dense<0.000000e+00> : vector<9xf32>
    %93 = vector.multi_reduction <add>, %92, %cst_37 [1] : vector<9x32xf32> to vector<9xf32>
    %94 = vector.shape_cast %93 : vector<9xf32> to vector<9x1xf32>
    %cst_38 = arith.constant 3.200000e+01 : f32
    %95 = vector.broadcast %cst_38 : f32 to vector<9x1xf32>
    %96 = arith.divf %94, %95 : vector<9x1xf32>
    %cst_39 = arith.constant 9.99999974E-6 : f32
    %97 = vector.broadcast %cst_39 : f32 to vector<9x1xf32>
    %98 = arith.addf %96, %97 : vector<9x1xf32>
    %99 = math.rsqrt %98 : vector<9x1xf32>
    %100 = vector.broadcast %99 : vector<9x1xf32> to vector<9x32xf32>
    %101 = arith.mulf %91, %100 : vector<9x32xf32>
    %102 = vector.broadcast %84 : vector<1x32xf32> to vector<9x32xf32>
    %103 = arith.mulf %101, %102 : vector<9x32xf32>
    %104 = vector.broadcast %85 : vector<1x32xf32> to vector<9x32xf32>
    %105 = arith.addf %103, %104 : vector<9x32xf32>
    %106 = arith.truncf %105 : vector<9x32xf32> to vector<9x32xbf16>
    %c0_40 = arith.constant 0 : index
    %c0_41 = arith.constant 0 : index
    %107 = vector.load %arg8[%c0_40, %c0_41] : memref<32x128xbf16, #tpu.memory_space<vmem>>, vector<32x128xbf16>
    %cst_42 = arith.constant dense<0.000000e+00> : vector<9x128xf32>
    %108 = tpu.matmul %106, %107, %cst_42 {dimension_numbers = #tpu.dot_dimension_numbers<[1], [0], [0], [1], [0, 0, 1, 1], [], []>} : vector<9x32xbf16>, vector<32x128xbf16>, vector<9x128xf32> -> vector<9x128xf32>
    %c0_43 = arith.constant 0 : index
    %c0_44 = arith.constant 0 : index
    %109 = vector.load %arg9[%c0_43, %c0_44] : memref<1x128xf32, #tpu.memory_space<vmem>>, vector<1x128xf32>
    %110 = vector.broadcast %109 : vector<1x128xf32> to vector<9x128xf32>
    %111 = arith.addf %108, %110 : vector<9x128xf32>
    %cst_45 = arith.constant 0.000000e+00 : f32
    %112 = vector.broadcast %cst_45 : f32 to vector<9x128xf32>
    %113 = arith.maximumf %111, %112 : vector<9x128xf32>
    %114 = arith.truncf %113 : vector<9x128xf32> to vector<9x128xbf16>
    %c0_46 = arith.constant 0 : index
    %c0_47 = arith.constant 0 : index
    %115 = vector.load %arg10[%c0_46, %c0_47] : memref<128x32xbf16, #tpu.memory_space<vmem>>, vector<128x32xbf16>
    %cst_48 = arith.constant dense<0.000000e+00> : vector<9x32xf32>
    %116 = tpu.matmul %114, %115, %cst_48 {dimension_numbers = #tpu.dot_dimension_numbers<[1], [0], [0], [1], [0, 0, 1, 1], [], []>} : vector<9x128xbf16>, vector<128x32xbf16>, vector<9x32xf32> -> vector<9x32xf32>
    %c0_49 = arith.constant 0 : index
    %c0_50 = arith.constant 0 : index
    %117 = vector.load %arg11[%c0_49, %c0_50] : memref<1x32xf32, #tpu.memory_space<vmem>>, vector<1x32xf32>
    %118 = vector.broadcast %117 : vector<1x32xf32> to vector<9x32xf32>
    %119 = arith.addf %116, %118 : vector<9x32xf32>
    %120 = arith.addf %105, %119 : vector<9x32xf32>
    %c0_51 = arith.constant 0 : index
    %c0_52 = arith.constant 0 : index
    %121 = vector.load %arg12[%c0_51, %c0_52] : memref<1x32xf32, #tpu.memory_space<vmem>>, vector<1x32xf32>
    %c0_53 = arith.constant 0 : index
    %c0_54 = arith.constant 0 : index
    %122 = vector.load %arg13[%c0_53, %c0_54] : memref<1x32xf32, #tpu.memory_space<vmem>>, vector<1x32xf32>
    %cst_55 = arith.constant dense<0.000000e+00> : vector<9xf32>
    %123 = vector.multi_reduction <add>, %120, %cst_55 [1] : vector<9x32xf32> to vector<9xf32>
    %124 = vector.shape_cast %123 : vector<9xf32> to vector<9x1xf32>
    %cst_56 = arith.constant 3.200000e+01 : f32
    %125 = vector.broadcast %cst_56 : f32 to vector<9x1xf32>
    %126 = arith.divf %124, %125 : vector<9x1xf32>
    %127 = vector.broadcast %126 : vector<9x1xf32> to vector<9x32xf32>
    %128 = arith.subf %120, %127 : vector<9x32xf32>
    %129 = arith.mulf %128, %128 : vector<9x32xf32>
    %cst_57 = arith.constant dense<0.000000e+00> : vector<9xf32>
    %130 = vector.multi_reduction <add>, %129, %cst_57 [1] : vector<9x32xf32> to vector<9xf32>
    %131 = vector.shape_cast %130 : vector<9xf32> to vector<9x1xf32>
    %cst_58 = arith.constant 3.200000e+01 : f32
    %132 = vector.broadcast %cst_58 : f32 to vector<9x1xf32>
    %133 = arith.divf %131, %132 : vector<9x1xf32>
    %cst_59 = arith.constant 9.99999974E-6 : f32
    %134 = vector.broadcast %cst_59 : f32 to vector<9x1xf32>
    %135 = arith.addf %133, %134 : vector<9x1xf32>
    %136 = math.rsqrt %135 : vector<9x1xf32>
    %137 = vector.broadcast %136 : vector<9x1xf32> to vector<9x32xf32>
    %138 = arith.mulf %128, %137 : vector<9x32xf32>
    %139 = vector.broadcast %121 : vector<1x32xf32> to vector<9x32xf32>
    %140 = arith.mulf %138, %139 : vector<9x32xf32>
    %141 = vector.broadcast %122 : vector<1x32xf32> to vector<9x32xf32>
    %142 = arith.addf %140, %141 : vector<9x32xf32>
    %c0_60 = arith.constant 0 : index
    %c0_61 = arith.constant 0 : index
    %c0_62 = arith.constant 0 : index
    %143 = vector.load %arg14[%c0_60, %c0_61, %c0_62] : memref<1x9x32xf32, #tpu.memory_space<vmem>>, vector<1x9x32xf32>
    %144 = vector.shape_cast %143 : vector<1x9x32xf32> to vector<9x32xf32>
    %145 = vector.shape_cast %142 : vector<9x32xf32> to vector<1x9x32xf32>
    tpu.vector_store %arg14[%c0_60, %c0_61, %c0_62], %145 {strides = array<i32>} : memref<1x9x32xf32, #tpu.memory_space<vmem>>, vector<1x9x32xf32>,
    return
  }
  func.func @transform_0(%arg0: i32) -> (i32, i32, i32) {
    %c0_i32 = arith.constant 0 : i32
    %c0_i32_0 = arith.constant 0 : i32
    %c0_i32_1 = arith.constant 0 : i32
    return %arg0, %c0_i32, %c0_i32_0 : i32, i32, i32
  }
  func.func @transform_1(%arg0: i32) -> (i32, i32) {
    %c0_i32 = arith.constant 0 : i32
    %c0_i32_0 = arith.constant 0 : i32
    %c0_i32_1 = arith.constant 0 : i32
    return %c0_i32, %c0_i32_0 : i32, i32
  }
  func.func @transform_2(%arg0: i32) -> (i32, i32) {
    %c0_i32 = arith.constant 0 : i32
    %c0_i32_0 = arith.constant 0 : i32
    %c0_i32_1 = arith.constant 0 : i32
    return %c0_i32, %c0_i32_0 : i32, i32
  }
  func.func @transform_3(%arg0: i32) -> (i32, i32) {
    %c0_i32 = arith.constant 0 : i32
    %c0_i32_0 = arith.constant 0 : i32
    %c0_i32_1 = arith.constant 0 : i32
    return %c0_i32, %c0_i32_0 : i32, i32
  }
  func.func @transform_4(%arg0: i32) -> (i32, i32) {
    %c0_i32 = arith.constant 0 : i32
    %c0_i32_0 = arith.constant 0 : i32
    %c0_i32_1 = arith.constant 0 : i32
    return %c0_i32, %c0_i32_0 : i32, i32
  }
  func.func @transform_5(%arg0: i32) -> (i32, i32) {
    %c0_i32 = arith.constant 0 : i32
    %c0_i32_0 = arith.constant 0 : i32
    %c0_i32_1 = arith.constant 0 : i32
    return %c0_i32, %c0_i32_0 : i32, i32
  }
  func.func @transform_6(%arg0: i32) -> (i32, i32) {
    %c0_i32 = arith.constant 0 : i32
    %c0_i32_0 = arith.constant 0 : i32
    %c0_i32_1 = arith.constant 0 : i32
    return %c0_i32, %c0_i32_0 : i32, i32
  }
  func.func @transform_7(%arg0: i32) -> (i32, i32) {
    %c0_i32 = arith.constant 0 : i32
    %c0_i32_0 = arith.constant 0 : i32
    %c0_i32_1 = arith.constant 0 : i32
    return %c0_i32, %c0_i32_0 : i32, i32
  }
  func.func @transform_8(%arg0: i32) -> (i32, i32) {
    %c0_i32 = arith.constant 0 : i32
    %c0_i32_0 = arith.constant 0 : i32
    %c0_i32_1 = arith.constant 0 : i32
    return %c0_i32, %c0_i32_0 : i32, i32
  }
  func.func @transform_9(%arg0: i32) -> (i32, i32) {
    %c0_i32 = arith.constant 0 : i32
    %c0_i32_0 = arith.constant 0 : i32
    %c0_i32_1 = arith.constant 0 : i32
    return %c0_i32, %c0_i32_0 : i32, i32
  }
  func.func @transform_10(%arg0: i32) -> (i32, i32) {
    %c0_i32 = arith.constant 0 : i32
    %c0_i32_0 = arith.constant 0 : i32
    %c0_i32_1 = arith.constant 0 : i32
    return %c0_i32, %c0_i32_0 : i32, i32
  }
  func.func @transform_11(%arg0: i32) -> (i32, i32) {
    %c0_i32 = arith.constant 0 : i32
    %c0_i32_0 = arith.constant 0 : i32
    %c0_i32_1 = arith.constant 0 : i32
    return %c0_i32, %c0_i32_0 : i32, i32
  }
  func.func @transform_12(%arg0: i32) -> (i32, i32) {
    %c0_i32 = arith.constant 0 : i32
    %c0_i32_0 = arith.constant 0 : i32
    %c0_i32_1 = arith.constant 0 : i32
    return %c0_i32, %c0_i32_0 : i32, i32
  }
  func.func @transform_13(%arg0: i32) -> (i32, i32, i32) {
    %c0_i32 = arith.constant 0 : i32
    %c0_i32_0 = arith.constant 0 : i32
    %c0_i32_1 = arith.constant 0 : i32
    return %arg0, %c0_i32, %c0_i32_0 : i32, i32, i32
  }
}

</mosaic_0001>

<bundles_post_ra>
// kernel: mem_head_forward.5
= control target key start
LH: loop header
LB: loop body
LE: loop exit
PB: predicated region body
PF: predicated region fallthrough
CT: control target
= control target key end

     0   :  { %s486_s18 = smov 0   ;;  %s528_s0 = inlined_call_operand.vmem [shape: f32[2,9,32], index: 0, kind: input, shape index: {}]   ;;  %s529_s1 = inlined_call_operand.vmem [shape: f32[1,32], index: 1, kind: input, shape index: {}]   ;;  %s530_s2 = inlined_call_operand.vmem [shape: f32[1,32], index: 2, kind: input, shape index: {}]   ;;  %s531_s3 = inlined_call_operand.vmem [shape: bf16[32,128], index: 3, kind: input, shape index: {}]   ;;  %s532_s4 = inlined_call_operand.vmem [shape: f32[1,128], index: 4, kind: input, shape index: {}]   ;;  %s533_s5 = inlined_call_operand.vmem [shape: f32[2,9,128], index: 5, kind: output, shape index: {}]  }
   0x1 LB: > { %s400_s19 = sadd.s32 4294967295, %s452_s18   ;;  %p404_p0 = scmp.ge.s32.totalorder %s452_s18, 1  ;;  %s452_s18 = sphi %s486_s18, %s15_s18  }
   0x2   : > { %p187_p1 = scmp.lt.s32.totalorder %s452_s18, 3 }
   0x4   : > { %p188_p2 = pnand %p404_p0, %p187_p1 }
   0x5   : > { %p215_p3 = scmp.lt.s32.totalorder (!%p188_p2), %s400_s19, 1 }
   0x6   : > { %191 = sbr.rel (%p188_p2) target bundleno = 529 (0x211), region = 40 }
   0xb   : > { %s535_s19 = smov (!%p215_p3, %s400_s19), 1  ;;  %vm230_vm0 = vcmask 261120   ;;  %vm234_vm1 = vcmask 253952   ;;  %v440_v14 = vld [vmem:[%s531_s3 + $0x8] sm:$0xff]   ;;  %v454_v15 = vmov 0.0   ;;  %vm455_vm2 = vmmov 0  }
   0xc   : > { %s417_s20 = sshll.u32 %s535_s19, 4  ;;  %422 = vmatprep.subr.bf16.mxu0 %v454_v15  ;;  %426 = vmatprep.mubr.msk.bf16.mxu0 %vm455_vm2, %v454_v15  ;;  %v441_v16 = vld [vmem:[%s531_s3] sm:$0xff]  }
   0xd   : > { %s219_s23 = scalar_lea.vmem %s528_s0, %s417_s20  ;;  %423 = vmatpush3.bf16.msra.mxu0 %v440_v14  ;;  %v409_v25 = vld [vmem:[%s529_s1] ss:$0 sm:$0xff]  ;;  %s224_s11 = scalar_lea.vmem %s533_s5, %s417_s20 }
   0xe   : > { %v226_v0 = vld [vmem:[%s219_s23] sm:$0xff]  ;;  %v227_v1 = vld [vmem:[%s219_s23 + $0x8] sm:$0x1]  ;;  %424 = vmatprep.subr.bf16.mxu0 %v454_v15 }
   0xf   : > { %v231_v2 = vsel %vm230_vm0, %v226_v0, 0.0  ;;  %v235_v3 = vsel %vm234_vm1, %v227_v1, 0.0  ;;  %v410_v29 = vld [vmem:[%s530_s2] ss:$0 sm:$0xff] }
  0x10   : > { %232 = vadd.xlane.f32.xlu0 %v231_v2  ;;  %v411_v34 = vld [vmem:[%s532_s4] ss:$0 sm:$0xff] }
  0x11   : > { %425 = vmatpush3.bf16.msra.mxu0 %v441_v16 }
  0x14   : > { %236 = vadd.xlane.f32.xlu0 %v235_v3 }
  0x99   : > { %v233_v4 = vpop.xlane.xlu0 %232 }
  0x9a   : > { %v239_v5 = vmul.f32 0.03125, %v233_v4 }
  0x9c   : > { %v241_v6 = vsub.f32 %v226_v0, %v239_v5 }
  0x9d   : > { %v237_v7 = vpop.xlane.xlu0 %236 }
  0x9e   : > { %v240_v8 = vmul.f32 0.03125, %v237_v7  ;;  %v243_v9 = vmul.f32 %v241_v6, %v241_v6 }
  0xa0   : > { %v242_v10 = vsub.f32 %v227_v1, %v240_v8  ;;  %v245_v11 = vsel %vm230_vm0, %v243_v9, 0.0 }
  0xa1   : > { %246 = vadd.xlane.f32.xlu1 %v245_v11 }
  0xa2   : > { %v244_v12 = vmul.f32 %v242_v10, %v242_v10 }
  0xa4   : > { %v248_v13 = vsel %vm234_vm1, %v244_v12, 0.0 }
  0xa5   : > { %249 = vadd.xlane.f32.xlu1 %v248_v13 }
 0x12a   : > { %v247_v17 = vpop.xlane.xlu1 %246 }
 0x12b   : > { %v251_v18 = vmul.f32 0.03125, %v247_v17 }
 0x12d   : > { %v253_v19 = vadd.f32 1e-05, %v251_v18 }
 0x12e   : > { %v250_v20 = vpop.xlane.xlu1 %249 }
 0x12f   : > { %442 = vrsqrt.f32 %v253_v19  ;;  %v252_v21 = vmul.f32 0.03125, %v250_v20 }
 0x131   : > { %v254_v22 = vadd.f32 1e-05, %v252_v21 }
 0x133   : > { %444 = vrsqrt.f32 %v254_v22 }
 0x13c   : > { %v443_v23 = vpop.eup %442 }
 0x13d   : > { %v257_v24 = vmul.f32 %v443_v23, %v241_v6 }
 0x13f   : > { %v265_v28 = vmul.f32 %v409_v25, %v257_v24 }
 0x140   : > { %v445_v26 = vpop.eup %444 }
 0x141   : > { %v258_v27 = vmul.f32 %v445_v26, %v242_v10  ;;  %v273_v31 = vadd.f32 %v410_v29, %v265_v28 }
 0x143   : > { %v266_v30 = vmul.f32 %v409_v25, %v258_v27 }
 0x145   : > { %v274_v32 = vadd.f32 %v410_v29, %v266_v30 }
 0x147   : > { %v275_v33 = vpack.c.bf16 %v274_v32, %v273_v31 }
 0x149   : > { %427 = vmatmul.mubr.msk.bf16.vlgmr.msra.gmra.mxu0 %vm230_vm0, %v275_v33 }
 0x209   : > { %v336_v35 = vpop.f32.mrf.mxu0 }
 0x20a   : > { %v337_v36 = vadd.f32 %v411_v34, %v336_v35 }
 0x20b   : > { %v428_v37 = vpop.f32.mrf.mxu0 }
 0x20c   : > { %343 = vst [vmem:[%s224_s11] sm:$0xff] %v337_v36 }
 0x20d   : > { %v339_v38 = vpop.f32.mrf.mxu0 }
 0x20e   : > { %v340_v39 = vadd.f32 %v411_v34, %v339_v38 }
 0x20f   : > { %v429_v40 = vpop.f32.mrf.mxu0 }
 0x210   : > { %344 = vst [vmem:[%s224_s11 + $0x8] sm:$0x1] %v340_v39 }
 0x211 PF: > { %s15_s18 = sadd.s32 1, %s452_s18  }
 0x212   : > { %p12_p4 = scmp.ge.s32.totalorder %s15_s18, 4  }
 0x214   :  { %14 = sbr.rel (!%p12_p4) target bundleno = 1 (0x1), region = 70 }

// kernel: mem_head_forward.3
= control target key start
LH: loop header
LB: loop body
LE: loop exit
PB: predicated region body
PF: predicated region fallthrough
CT: control target
= control target key end

     0   :  { %s2164_s25 = smov 0   ;;  %s2389_s0 = inlined_call_operand.vmem [shape: f32[2,9,32], index: 0, kind: input, shape index: {}]   ;;  %s2390_s1 = inlined_call_operand.vmem [shape: bf16[32,96], index: 1, kind: input, shape index: {}]   ;;  %s2391_s2 = inlined_call_operand.vmem [shape: f32[1,96], index: 2, kind: input, shape index: {}]   ;;  %s2392_s3 = inlined_call_operand.vmem [shape: bf16[32,32], index: 3, kind: input, shape index: {}]   ;;  %s2393_s4 = inlined_call_operand.vmem [shape: f32[1,32], index: 4, kind: input, shape index: {}]   ;;  %s2394_s5 = inlined_call_operand.vmem [shape: f32[1,32], index: 5, kind: input, shape index: {}]   ;;  %s2395_s6 = inlined_call_operand.vmem [shape: f32[1,32], index: 6, kind: input, shape index: {}]   ;;  %s2396_s7 = inlined_call_operand.vmem [shape: bf16[32,128], index: 7, kind: input, shape index: {}]   ;;  %s2397_s8 = inlined_call_operand.vmem [shape: f32[1,128], index: 8, kind: input, shape index: {}]   ;;  %s2398_s9 = inlined_call_operand.vmem [shape: bf16[128,32], index: 9, kind: input, shape index: {}]   ;;  %s2399_s10 = inlined_call_operand.vmem [shape: f32[1,32], index: 10, kind: input, shape index: {}]   ;;  %s2400_s11 = inlined_call_operand.vmem [shape: f32[1,32], index: 11, kind: input, shape index: {}]   ;;  %s2401_s12 = inlined_call_operand.vmem [shape: f32[1,32], index: 12, kind: input, shape index: {}]   ;;  %s2402_s13 = inlined_call_operand.vmem [shape: f32[2,9,32], index: 13, kind: output, shape index: {}]  }
   0x1 LB: > { %s1761_s26 = sadd.s32 4294967295, %s2076_s25   ;;  %p1765_p0 = scmp.ge.s32.totalorder %s2076_s25, 1  ;;  %s2076_s25 = sphi %s2164_s25, %s23_s25  }
   0x2   : > { %p387_p1 = scmp.lt.s32.totalorder %s2076_s25, 3 }
   0x4   : > { %p388_p2 = pnand %p1765_p0, %p387_p1 }
   0x5   : > { %p431_p3 = scmp.lt.s32.totalorder (!%p388_p2), %s1761_s26, 1  ;;  %s2080_s20 = smov (!%p388_p2), 96  }
   0x6   : > { %391 = sbr.rel (%p388_p2) target bundleno = 3511 (0xdb7), region = 72  ;;  %s2081_s21 = smov (!%p388_p2), 64  }
   0x7   : > { %s2082_s22 = smov (!%p388_p2), 80   ;;  %s2083_s23 = smov (!%p388_p2), 88  }
   0x8   : > { %s2084_s24 = smov (!%p388_p2), 120   ;;  %s2085_s27 = smov (!%p388_p2), 112  }
   0x9   : > { %s2086_s28 = smov (!%p388_p2), 56   ;;  %s2087_s29 = smov (!%p388_p2), 48  }
   0xa   : > { %s2088_s30 = smov (!%p388_p2), 72   ;;  %s2089_s15 = smov (!%p388_p2), 104  }
   0xb   : > { %v2016_v0 = vld [vmem:[%s2390_s1 + $0x8] sm:$0xff]   ;;  %v2078_v1 = vmov 0.0   ;;  %v2017_v2 = vld [vmem:[%s2390_s1] sm:$0xff]   ;;  %vm2079_vm0 = vmmov 0   ;;  %s2404_s26 = smov (!%p431_p3, %s1761_s26), 1  ;;  %vm468_vm1 = vcmask 261120  }
   0xc   : > { %1877 = vmatprep.subr.bf16.mxu1 %v2078_v1  ;;  %1881 = vmatprep.mubr.msk.bf16.mxu1 %vm2079_vm0, %v2078_v1  ;;  %s1825_s14 = sshll.u32 %s2404_s26, 4  ;;  %v1770_v6 = vld [vmem:[%s2391_s2] ss:$0 sm:$0xff]  ;;  %vm519_vm2 = vcmask 64512   ;;  %vm605_vm3 = vcmask 72704   ;;  %vm609_vm4 = vcmask 65536  }
   0xd   : > { %1878 = vmatpush3.bf16.msra.mxu1 %v2016_v0  ;;  %s435_s17 = scalar_lea.vmem %s2389_s0, %s1825_s14  ;;  %vm640_vm5 = vcmask 1040384   ;;  %s2090_s16 = smov 40   ;;  %vm1353_vm6 = vcmask 130048   ;;  %vm1356_vm7 = vcmask 195584   ;;  %vm1434_vm8 = vcmask 253952  }
   0xe   : > { %1879 = vmatprep.subr.bf16.mxu1 %v2078_v1  ;;  %v2190_v3 = vld [vmem:[%s435_s17] sm:$0xff]  ;;  %v2192_v4 = vld [vmem:[%s435_s17 + $0x8] sm:$0x1]  ;;  %s2091_s17 = smov 8   ;;  %s2092_s18 = smov 16  }
   0xf   : > { %v444_v5 = vpack.c.bf16 %v2192_v4, %v2190_v3 }
  0x11   : > { %1880 = vmatpush3.bf16.msra.mxu1 %v2017_v2 }
  0x14   : > { %1882 = vmatmul.mubr.msk.bf16.vlgmr.msra.gmra.mxu1 %vm468_vm1, %v444_v5 }
  0xd4   : > { %v506_v7 = vpop.f32.mrf.mxu1 }
  0xd5   : > { %v2200_v8 = vadd.f32 %v1770_v6, %v506_v7 }
  0xd6   : > { %v1883_v9 = vpop.f32.mrf.mxu1 }
  0xd7   : > { %1889 = vmatprep.mubr.msk.f32.mxu1 %vm519_vm2, %v2200_v8 }
  0xd8   : > { %v509_v10 = vpop.f32.mrf.mxu1 }
  0xd9   : > { %v2204_v11 = vadd.f32 %v1770_v6, %v509_v10 }
  0xda   : > { %v1884_v12 = vpop.f32.mrf.mxu1 }
  0xdb   : > { %517 = vrot.lane.b32.xlu0 %v2204_v11, %s2080_s20 }
  0xdf   : > { %515 = vrot.lane.b32.xlu0 %v2200_v8, %s2080_s20 }
 0x14d   : > { %v518_v13 = vpop.permute.xlu0 %517 }
 0x14e   : > { %1885 = vmatprep.subr.msk.mxu1 %vm519_vm2, %v518_v13 }
 0x14f   : > { %1886 = vmatpush3.xpose.msk.msra.mxu1 %vm519_vm2, %v518_v13 }
 0x151   : > { %v516_v14 = vpop.permute.xlu0 %515 }
 0x152   : > { %1887 = vmatprep.subr.msk.mxu1 %vm519_vm2, %v516_v14 }
 0x153   : > { %1888 = vmatpush3.xpose.msk.msra.mxu1 %vm519_vm2, %v516_v14 }
 0x156   : > { %1890 = vmatmul.mubr.msk.f32.vlgmr.msra.gmra.mxu1 %vm519_vm2, %v2204_v11 }
 0x216   : > { %v1891_v15 = vpop.f32.mrf.mxu1 }
 0x217   : > { %v604_v18 = vmul.f32 0.35355338, %v1891_v15 }
 0x218   : > { %v594_v16 = vpop.f32.mrf.mxu1 }
 0x219   : > { %v603_v17 = vmul.f32 0.35355338, %v594_v16  ;;  %v610_v20 = vsel %vm609_vm4, %v604_v18, -inf }
 0x21b   : > { %v606_v19 = vsel %vm605_vm3, %v603_v17, -inf }
 0x21c   : > { %607 = vmax.xlane.f32.xlu1 %v606_v19 }
 0x220   : > { %611 = vmax.xlane.f32.xlu1 %v610_v20 }
 0x2a5   : > { %v608_v21 = vpop.xlane.xlu1 %607 }
 0x2a6   : > { %v613_v22 = vsub.f32 %v603_v17, %v608_v21 }
 0x2a8   : > { %v615_v23 = vmul.f32 1.442695, %v613_v22 }
 0x2a9   : > { %v612_v24 = vpop.xlane.xlu1 %611 }
 0x2aa   : > { %2030 = vpow2.f32 %v615_v23  ;;  %v614_v25 = vsub.f32 %v604_v18, %v612_v24 }
 0x2ac   : > { %v617_v26 = vmul.f32 1.442695, %v614_v25 }
 0x2ae   : > { %2032 = vpow2.f32 %v617_v26 }
 0x2b7   : > { %v2031_v27 = vpop.eup %2030 }
 0x2b8   : > { %v619_v28 = vsel %vm605_vm3, %v2031_v27, 0.0 }
 0x2b9   : > { %620 = vadd.xlane.f32.xlu0 %v619_v28 }
 0x2bb   : > { %v2033_v29 = vpop.eup %2032 }
 0x2bc   : > { %v622_v30 = vsel %vm609_vm4, %v2033_v29, 0.0 }
 0x2bd   : > { %623 = vadd.xlane.f32.xlu1 %v622_v30 }
 0x2ce   : > { %631 = vrot.lane.b32.xlu1 %v2204_v11, %s2081_s21 }
 0x2cf   : > { %927 = vrot.lane.b32.xlu0 %v2204_v11, %s2082_s22 }
 0x2d2   : > { %629 = vrot.lane.b32.xlu1 %v2200_v8, %s2081_s21 }
 0x2d6   : > { %724 = vrot.lane.b32.xlu1 %v2204_v11, %s2083_s23 }
 0x2da   : > { %722 = vrot.lane.b32.xlu1 %v2200_v8, %s2083_s23  ;;  %s2093_s23 = smov 24  }
 0x2de   : > { %718 = vrot.lane.b32.xlu1 %v2200_v8, %s2084_s24 }
 0x2e2   : > { %720 = vrot.lane.b32.xlu1 %v2204_v11, %s2084_s24 }
 0x2e6   : > { %925 = vrot.lane.b32.xlu1 %v2200_v8, %s2082_s22 }
 0x2ea   : > { %921 = vrot.lane.b32.xlu1 %v2200_v8, %s2085_s27 }
 0x2ee   : > { %923 = vrot.lane.b32.xlu1 %v2204_v11, %s2085_s27 }
 0x342   : > { %v621_v31 = vpop.xlane.xlu0 %620 }
 0x343   : > { %2034 = vrcp.f32 %v621_v31 }
 0x346   : > { %v928_v32 = vpop.permute.xlu0 %927  ;;  %v624_v33 = vpop.xlane.xlu1 %623 }
 0x347   : > { %2036 = vrcp.f32 %v624_v33  ;;  %1913 = vmatprep.subr.msk.mxu0 %vm519_vm2, %v928_v32 }
 0x348   : > { %1914 = vmatpush3.xpose.msk.msra.mxu0 %vm519_vm2, %v928_v32 }
 0x34a   : > { %v632_v34 = vpop.permute.xlu1 %631 }
 0x34b   : > { %1892 = vmatprep.subr.msk.mxu1 %vm640_vm5, %v632_v34 }
 0x34c   : > { %1893 = vmatpush3.msk.msra.mxu1 %vm640_vm5, %v632_v34 }
 0x34e   : > { %v630_v35 = vpop.permute.xlu1 %629 }
 0x34f   : > { %1894 = vmatprep.subr.mxu1 %v630_v35 }
 0x350   : > { %v2035_v36 = vpop.eup %2034  ;;  %1895 = vmatpush3.msra.mxu1 %v630_v35 }
 0x351   : > { %v627_v37 = vmul.f32 %v2035_v36, %v2031_v27 }
 0x352   : > { %v725_v38 = vpop.permute.xlu1 %724 }
 0x353   : > { %1896 = vmatprep.mubr.msk.f32.mxu1 %vm605_vm3, %v627_v37  ;;  %1899 = vmatprep.subr.msk.mxu1 %vm519_vm2, %v725_v38 }
 0x354   : > { %v2037_v39 = vpop.eup %2036 }
 0x355   : > { %v628_v40 = vmul.f32 %v2037_v39, %v2033_v29 }
 0x356   : > { %v723_v41 = vpop.permute.xlu1 %722 }
 0x357   : > { %1897 = vmatmul.mubr.msk.f32.vlgmr.msra.gmra.mxu1 %vm605_vm3, %v628_v40 }
 0x358   : > { %1900 = vmatpush3.xpose.msk.msra.mxu1 %vm519_vm2, %v725_v38 }
 0x359   : > { %1901 = vmatprep.subr.msk.mxu1 %vm519_vm2, %v723_v41 }
 0x35a   : > { %v719_v42 = vpop.permute.xlu1 %718 }
 0x35b   : > { %1903 = vmatprep.mubr.msk.f32.mxu1 %vm519_vm2, %v719_v42 }
 0x35c   : > { %1902 = vmatpush3.xpose.msk.msra.mxu1 %vm519_vm2, %v723_v41 }
 0x35e   : > { %v721_v43 = vpop.permute.xlu1 %720 }
 0x35f   : > { %1904 = vmatmul.mubr.msk.f32.vlgmr.msra.gmra.mxu1 %vm519_vm2, %v721_v43 }
 0x362   : > { %v926_v44 = vpop.permute.xlu1 %925 }
 0x363   : > { %1915 = vmatprep.subr.msk.mxu0 %vm519_vm2, %v926_v44 }
 0x364   : > { %1916 = vmatpush3.xpose.msk.msra.mxu0 %vm519_vm2, %v926_v44 }
 0x366   : > { %v922_v45 = vpop.permute.xlu1 %921 }
 0x367   : > { %1917 = vmatprep.mubr.msk.f32.mxu0 %vm519_vm2, %v922_v45 }
 0x36a   : > { %v924_v46 = vpop.permute.xlu1 %923 }
 0x36b   : > { %1918 = vmatmul.mubr.msk.f32.vlgmr.msra.gmra.mxu0 %vm519_vm2, %v924_v46 }
 0x417   : > { %v2244_v47 = vpop.f32.mrf.mxu1 }
 0x419   : > { %v2246_v48 = vpop.f32.mrf.mxu1 }
 0x41f   : > { %v1905_v49 = vpop.f32.mrf.mxu1 }
 0x420   : > { %v810_v50 = vmul.f32 0.35355338, %v1905_v49 }
 0x421   : > { %v800_v51 = vpop.f32.mrf.mxu1 }
 0x422   : > { %v809_v52 = vmul.f32 0.35355338, %v800_v51  ;;  %v814_v53 = vsel %vm609_vm4, %v810_v50, -inf }
 0x423   : > { %815 = vmax.xlane.f32.xlu1 %v814_v53 }
 0x424   : > { %v811_v54 = vsel %vm605_vm3, %v809_v52, -inf }
 0x425   : > { %812 = vmax.xlane.f32.xlu0 %v811_v54 }
 0x42b   : > { %v1919_v55 = vpop.f32.mrf.mxu0 }
 0x42c   : > { %v1013_v58 = vmul.f32 0.35355338, %v1919_v55 }
 0x42d   : > { %v1003_v56 = vpop.f32.mrf.mxu0 }
 0x42e   : > { %v1012_v57 = vmul.f32 0.35355338, %v1003_v56  ;;  %v1017_v60 = vsel %vm609_vm4, %v1013_v58, -inf }
 0x430   : > { %v1014_v59 = vsel %vm605_vm3, %v1012_v57, -inf }
 0x431   : > { %1015 = vmax.xlane.f32.xlu0 %v1014_v59 }
 0x435   : > { %1018 = vmax.xlane.f32.xlu0 %v1017_v60 }
 0x4ac   : > { %v816_v13 = vpop.xlane.xlu1 %815 }
 0x4ad   : > { %v818_v14 = vsub.f32 %v810_v50, %v816_v13 }
 0x4ae   : > { %v813_v61 = vpop.xlane.xlu0 %812 }
 0x4af   : > { %v821_v15 = vmul.f32 1.442695, %v818_v14  ;;  %v817_v16 = vsub.f32 %v809_v52, %v813_v61  ;;  %v2019_v14 = vld [vmem:[%s2392_s3] sm:$0xff]  }
 0x4b1   : > { %v819_v17 = vmul.f32 1.442695, %v817_v16 }
 0x4ba   : > { %v1016_v62 = vpop.xlane.xlu0 %1015 }
 0x4bb   : > { %v1020_v63 = vsub.f32 %v1012_v57, %v1016_v62 }
 0x4bd   : > { %v1022_v0 = vmul.f32 1.442695, %v1020_v63 }
 0x4be   : > { %v1019_v2 = vpop.xlane.xlu0 %1018 }
 0x4bf   : > { %2038 = vpow2.f32 %v1022_v0  ;;  %v1021_v5 = vsub.f32 %v1013_v58, %v1019_v2 }
 0x4c1   : > { %v1024_v6 = vmul.f32 1.442695, %v1021_v5 }
 0x4c3   : > { %2040 = vpow2.f32 %v1024_v6 }
 0x4c4   : > { %2042 = vpow2.f32 %v821_v15 }
 0x4c5   : > { %2044 = vpow2.f32 %v819_v17 }
 0x4cc   : > { %v2039_v7 = vpop.eup %2038 }
 0x4cd   : > { %v1026_v9 = vsel %vm605_vm3, %v2039_v7, 0.0 }
 0x4ce   : > { %1027 = vadd.xlane.f32.xlu1 %v1026_v9 }
 0x4d0   : > { %v2041_v10 = vpop.eup %2040 }
 0x4d1   : > { %v1029_v12 = vsel %vm609_vm4, %v2041_v10, 0.0  ;;  %v2043_v18 = vpop.eup %2042 }
 0x4d2   : > { %1030 = vadd.xlane.f32.xlu0 %v1029_v12  ;;  %v826_v19 = vsel %vm609_vm4, %v2043_v18, 0.0  ;;  %v2045_v20 = vpop.eup %2044 }
 0x4d3   : > { %v823_v21 = vsel %vm605_vm3, %v2045_v20, 0.0 }
 0x4df   : > { %835 = vrot.lane.b32.xlu1 %v2204_v11, %s2086_s28 }
 0x4e3   : > { %1038 = vrot.lane.b32.xlu1 %v2204_v11, %s2087_s29 }
 0x4e7   : > { %1036 = vrot.lane.b32.xlu1 %v2200_v8, %s2087_s29 }
 0x4e8   : > { %833 = vrot.lane.b32.xlu0 %v2200_v8, %s2086_s28 }
 0x507   : > { %827 = vadd.xlane.f32.xlu0 %v826_v19 }
 0x50b   : > { %824 = vadd.xlane.f32.xlu1 %v823_v21 }
 0x51c   : > { %1128 = vrot.lane.b32.xlu1 %v2200_v8, %s2088_s30 }
 0x51d   : > { %1130 = vrot.lane.b32.xlu0 %v2204_v11, %s2088_s30 }
 0x520   : > { %1126 = vrot.lane.b32.xlu1 %v2204_v11, %s2089_s15 }
 0x521   : > { %1124 = vrot.lane.b32.xlu0 %v2200_v8, %s2089_s15 }
 0x557   : > { %v1028_v22 = vpop.xlane.xlu1 %1027 }
 0x558   : > { %2046 = vrcp.f32 %v1028_v22 }
 0x55b   : > { %v1031_v23 = vpop.xlane.xlu0 %1030  ;;  %v836_v24 = vpop.permute.xlu1 %835 }
 0x55c   : > { %1906 = vmatprep.subr.msk.mxu1 %vm640_vm5, %v836_v24 }
 0x55d   : > { %1907 = vmatpush3.msk.msra.mxu1 %vm640_vm5, %v836_v24 }
 0x55f   : > { %v834_v25 = vpop.permute.xlu0 %833  ;;  %v1039_v26 = vpop.permute.xlu1 %1038 }
 0x560   : > { %1908 = vmatprep.subr.mxu1 %v834_v25 }
 0x561   : > { %1909 = vmatpush3.msra.mxu1 %v834_v25 }
 0x562   : > { %1920 = vmatprep.subr.msk.mxu1 %vm640_vm5, %v1039_v26 }
 0x563   : > { %v1037_v27 = vpop.permute.xlu1 %1036 }
 0x565   : > { %v2047_v30 = vpop.eup %2046 }
 0x566   : > { %v1034_v37 = vmul.f32 %v2047_v30, %v2039_v7 }
 0x590   : > { %v828_v28 = vpop.xlane.xlu0 %827 }
 0x591   : > { %2048 = vrcp.f32 %v828_v28 }
 0x594   : > { %v825_v29 = vpop.xlane.xlu1 %824  ;;  %v1131_v34 = vpop.permute.xlu0 %1130 }
 0x595   : > { %2050 = vrcp.f32 %v825_v29 }
 0x596   : > { %2052 = vrcp.f32 %v1031_v23 }
 0x598   : > { %v1125_v39 = vpop.permute.xlu0 %1124  ;;  %v1129_v40 = vpop.permute.xlu1 %1128 }
 0x59c   : > { %v1127_v41 = vpop.permute.xlu1 %1126 }
 0x59e   : > { %v2049_v31 = vpop.eup %2048 }
 0x59f   : > { %v832_v35 = vmul.f32 %v2049_v31, %v2043_v18 }
 0x5a2   : > { %v2051_v32 = vpop.eup %2050 }
 0x5a3   : > { %v831_v33 = vmul.f32 %v2051_v32, %v2045_v20  ;;  %v2053_v36 = vpop.eup %2052 }
 0x5a4   : > { %v1035_v38 = vmul.f32 %v2053_v36, %v2041_v10 }
 0x5a5   : > { %1910 = vmatprep.mubr.msk.f32.mxu1 %vm605_vm3, %v831_v33 }
 0x5a6   : > { %1911 = vmatmul.mubr.msk.f32.vlgmr.msra.gmra.mxu1 %vm605_vm3, %v832_v35 }
 0x5a7   : > { %1921 = vmatpush3.msk.msra.mxu1 %vm640_vm5, %v1039_v26  ;;  %1924 = vmatprep.mubr.msk.f32.mxu1 %vm605_vm3, %v1034_v37 }
 0x5a8   : > { %1922 = vmatprep.subr.mxu1 %v1037_v27 }
 0x5a9   : > { %1923 = vmatpush3.msra.mxu1 %v1037_v27 }
 0x5aa   : > { %1927 = vmatprep.subr.msk.mxu1 %vm519_vm2, %v1131_v34  ;;  %1925 = vmatmul.mubr.msk.f32.vlgmr.msra.gmra.mxu1 %vm605_vm3, %v1035_v38 }
 0x5ab   : > { %1928 = vmatpush3.xpose.msk.msra.mxu1 %vm519_vm2, %v1131_v34  ;;  %1931 = vmatprep.mubr.msk.f32.mxu1 %vm519_vm2, %v1125_v39  ;;  %v1802_v34 = vld [vmem:[%s2393_s4] ss:$0 sm:$0xff] }
 0x5ac   : > { %1929 = vmatprep.subr.msk.mxu1 %vm519_vm2, %v1129_v40 }
 0x5af   : > { %1930 = vmatpush3.xpose.msk.msra.mxu1 %vm519_vm2, %v1129_v40 }
 0x5b0   : > { %1949 = vmatprep.subr.bf16.mxu1 %v2078_v1 }
 0x5b2   : > { %1932 = vmatmul.mubr.msk.f32.vlgmr.msra.gmra.mxu1 %vm519_vm2, %v1127_v41 }
 0x5b3   : > { %1953 = vmatprep.mubr.msk.bf16.mxu1 %vm2079_vm0, %v2078_v1 }
 0x666   : > { %v1912_v42 = vpop.f32.mrf.mxu1 }
 0x668   : > { %v912_v43 = vpop.f32.mrf.mxu1 }
 0x669   : > { %v2001_v54 = vpack.i.bf16 %v1912_v42, %v912_v43 }
 0x66a   : > { %v1926_v44 = vpop.f32.mrf.mxu1 }
 0x66c   : > { %v1115_v45 = vpop.f32.mrf.mxu1 }
 0x66d   : > { %v2006_v55 = vpack.i.bf16 %v1926_v44, %v1115_v45 }
 0x672   : > { %v1933_v46 = vpop.f32.mrf.mxu1 }
 0x673   : > { %v1216_v49 = vmul.f32 0.35355338, %v1933_v46 }
 0x674   : > { %v1206_v50 = vpop.f32.mrf.mxu1 }
 0x675   : > { %v1215_v51 = vmul.f32 0.35355338, %v1206_v50  ;;  %v1220_v52 = vsel %vm609_vm4, %v1216_v49, -inf }
 0x676   : > { %1221 = vmax.xlane.f32.xlu1 %v1220_v52 }
 0x677   : > { %v1217_v53 = vsel %vm605_vm3, %v1215_v51, -inf }
 0x678   : > { %1218 = vmax.xlane.f32.xlu0 %v1217_v53 }
 0x687   : > { %1241 = vrot.lane.b32.xlu1 %v2204_v11, %s2090_s16 }
 0x68b   : > { %2002 = vrot.lane.b32.xlu1 %v2001_v54, %s2091_s17  ;;  %v2021_v54 = vld [vmem:[%s2396_s7] sm:$0xff]  }
 0x68f   : > { %2007 = vrot.lane.b32.xlu1 %v2006_v55, %s2092_s18  ;;  %v2022_v55 = vld [vmem:[%s2398_s9 + $0x38] sm:$0xff]   ;;  %s440_s18 = scalar_lea.vmem %s2402_s13, %s1825_s14 }
 0x6ff   : > { %v1222_v56 = vpop.xlane.xlu1 %1221 }
 0x700   : > { %v1224_v57 = vsub.f32 %v1216_v49, %v1222_v56  ;;  %v2023_v56 = vld [vmem:[%s2398_s9 + $0x30] sm:$0xff]  }
 0x701   : > { %v1219_v58 = vpop.xlane.xlu0 %1218 }
 0x702   : > { %v1227_v59 = vmul.f32 1.442695, %v1224_v57  ;;  %v1223_v60 = vsub.f32 %v1215_v51, %v1219_v58  ;;  %v2024_v57 = vld [vmem:[%s2398_s9 + $0x28] sm:$0xff]   ;;  %v2025_v58 = vld [vmem:[%s2398_s9 + $0x20] sm:$0xff]  }
 0x703   : > { %v1242_v61 = vpop.permute.xlu1 %1241 }
 0x704   : > { %2054 = vpow2.f32 %v1227_v59  ;;  %v1225_v62 = vmul.f32 1.442695, %v1223_v60  ;;  %1934 = vmatprep.subr.msk.mxu0 %vm640_vm5, %v1242_v61  ;;  %v2026_v59 = vld [vmem:[%s2398_s9 + $0x18] sm:$0xff]  }
 0x705   : > { %1935 = vmatpush3.msk.msra.mxu0 %vm640_vm5, %v1242_v61 }
 0x706   : > { %2056 = vpow2.f32 %v1225_v62 }
 0x707   : > { %v2003_v18 = vpop.permute.xlu1 %2002 }
 0x708   : > { %v2005_v20 = vunpack.i.h.bf16 %v2003_v18  ;;  %v2004_v21 = vunpack.i.l.bf16 %v2003_v18  ;;  %v2029_v18 = vld [vmem:[%s2398_s9] sm:$0xff]  }
 0x70a   : > { %v1352_v25 = vsel %vm519_vm2, %v2244_v47, %v2005_v20  ;;  %v1351_v26 = vsel %vm519_vm2, %v2246_v48, %v2004_v21 }
 0x70b   : > { %v2008_v19 = vpop.permute.xlu1 %2007 }
 0x70c   : > { %v2010_v22 = vunpack.i.h.bf16 %v2008_v19  ;;  %v2009_v23 = vunpack.i.l.bf16 %v2008_v19  ;;  %v1808_v19 = vld [vmem:[%s2397_s8] ss:$0 sm:$0xff] }
 0x70e   : > { %v1354_v29 = vsel %vm1353_vm6, %v1351_v26, %v2009_v23  ;;  %v1355_v30 = vsel %vm1353_vm6, %v1352_v25, %v2010_v22 }
 0x711   : > { %v2055_v11 = vpop.eup %2054 }
 0x712   : > { %v1232_v63 = vsel %vm609_vm4, %v2055_v11, 0.0 }
 0x713   : > { %v2057_v0 = vpop.eup %2056  ;;  %1233 = vadd.xlane.f32.xlu0 %v1232_v63 }
 0x714   : > { %v1229_v2 = vsel %vm605_vm3, %v2057_v0, 0.0 }
 0x717   : > { %1230 = vadd.xlane.f32.xlu0 %v1229_v2 }
 0x72d   : > { %1239 = vrot.lane.b32.xlu0 %v2200_v8, %s2090_s16  ;;  %v2018_v8 = vld [vmem:[%s2392_s3 + $0x8] sm:$0xff]  }
 0x79c   : > { %v1234_v5 = vpop.xlane.xlu0 %1233 }
 0x79d   : > { %2058 = vrcp.f32 %v1234_v5 }
 0x7a0   : > { %v1231_v6 = vpop.xlane.xlu0 %1230 }
 0x7a1   : > { %2060 = vrcp.f32 %v1231_v6  ;;  %v1806_v6 = vld [vmem:[%s2394_s5] ss:$0 sm:$0xff] }
 0x7a4   : > { %v1240_v7 = vpop.permute.xlu0 %1239 }
 0x7a5   : > { %1936 = vmatprep.subr.mxu0 %v1240_v7 }
 0x7a6   : > { %1937 = vmatpush3.msra.mxu0 %v1240_v7 }
 0x7a7   : > { %1941 = vmatprep.subr.bf16.mxu0 %v2078_v1 }
 0x7aa   : > { %v2059_v9 = vpop.eup %2058 }
 0x7ab   : > { %v1238_v13 = vmul.f32 %v2059_v9, %v2055_v11 }
 0x7ae   : > { %v2061_v10 = vpop.eup %2060 }
 0x7af   : > { %v1237_v12 = vmul.f32 %v2061_v10, %v2057_v0 }
 0x7b1   : > { %1938 = vmatprep.mubr.msk.f32.mxu0 %vm605_vm3, %v1237_v12  ;;  %v1807_v12 = vld [vmem:[%s2395_s6] ss:$0 sm:$0xff] }
 0x7b2   : > { %1939 = vmatmul.mubr.msk.f32.vlgmr.msra.gmra.mxu0 %vm605_vm3, %v1238_v13 }
 0x7b3   : > { %1945 = vmatprep.mubr.msk.bf16.mxu0 %vm2079_vm0, %v2078_v1  ;;  %1942 = vmatpush3.bf16.msra.mxu0 %v2018_v8 }
 0x7b4   : > { %1943 = vmatprep.subr.bf16.mxu0 %v2078_v1 }
 0x7b7   : > { %1944 = vmatpush3.bf16.msra.mxu0 %v2019_v14 }
 0x7b8   : > { %1957 = vmatprep.subr.bf16.mxu0 %v2078_v1 }
 0x872   : > { %v1940_v15 = vpop.f32.mrf.mxu0 }
 0x874   : > { %v1318_v16 = vpop.f32.mrf.mxu0 }
 0x875   : > { %v2011_v17 = vpack.i.bf16 %v1940_v15, %v1318_v16  ;;  %v2027_v16 = vld [vmem:[%s2398_s9 + $0x10] sm:$0xff]  }
 0x877   : > { %2012 = vrot.lane.b32.xlu0 %v2011_v17, %s2093_s23  ;;  %v2028_v17 = vld [vmem:[%s2398_s9 + $0x8] sm:$0xff]  }
 0x8e9   : > { %v2013_v24 = vpop.permute.xlu0 %2012 }
 0x8ea   : > { %v2015_v27 = vunpack.i.h.bf16 %v2013_v24  ;;  %v2014_v28 = vunpack.i.l.bf16 %v2013_v24 }
 0x8ec   : > { %v1358_v31 = vsel %vm1356_vm7, %v1355_v30, %v2015_v27  ;;  %v1357_v32 = vsel %vm1356_vm7, %v1354_v29, %v2014_v28 }
 0x8ed   : > { %v1359_v33 = vpack.c.bf16 %v1358_v31, %v1357_v32 }
 0x8ef   : > { %1946 = vmatmul.mubr.msk.bf16.vlgmr.msra.gmra.mxu0 %vm468_vm1, %v1359_v33 }
 0x8f0   : > { %1973 = vmatprep.mubr.msk.bf16.mxu0 %vm2079_vm0, %v2078_v1  ;;  %1958 = vmatpush3.bf16.msra.mxu0 %v2022_v55 }
 0x8f1   : > { %1959 = vmatprep.subr.bf16.mxu0 %v2078_v1 }
 0x8f4   : > { %1960 = vmatpush3.bf16.msra.mxu0 %v2023_v56  ;;  %v1822_v56 = vld [vmem:[%s2401_s12] ss:$0 sm:$0xff] }
 0x8f5   : > { %1961 = vmatprep.subr.bf16.mxu0 %v2078_v1 }
 0x8f8   : > { %1962 = vmatpush3.bf16.msra.mxu0 %v2024_v57 }
 0x8f9   : > { %1963 = vmatprep.subr.bf16.mxu0 %v2078_v1 }
 0x8fc   : > { %1964 = vmatpush3.bf16.msra.mxu0 %v2025_v58 }
 0x8fd   : > { %1965 = vmatprep.subr.bf16.mxu0 %v2078_v1 }
 0x900   : > { %1966 = vmatpush3.bf16.msra.mxu0 %v2026_v59 }
 0x901   : > { %1967 = vmatprep.subr.bf16.mxu0 %v2078_v1 }
 0x904   : > { %1968 = vmatpush3.bf16.msra.mxu0 %v2027_v16 }
 0x905   : > { %1969 = vmatprep.subr.bf16.mxu0 %v2078_v1 }
 0x908   : > { %1970 = vmatpush3.bf16.msra.mxu0 %v2028_v17 }
 0x909   : > { %1971 = vmatprep.subr.bf16.mxu0 %v2078_v1 }
 0x90c   : > { %1972 = vmatpush3.bf16.msra.mxu0 %v2029_v18 }
 0x9af   : > { %v1420_v47 = vpop.f32.mrf.mxu0 }
 0x9b0   : > { %v1421_v35 = vadd.f32 %v1802_v34, %v1420_v47 }
 0x9b1   : > { %v1947_v36 = vpop.f32.mrf.mxu0 }
 0x9b2   : > { %v1427_v48 = vadd.f32 %v1421_v35, %v2190_v3 }
 0x9b3   : > { %v1423_v37 = vpop.f32.mrf.mxu0 }
 0x9b4   : > { %v1424_v38 = vadd.f32 %v1802_v34, %v1423_v37  ;;  %v1431_v39 = vsel %vm468_vm1, %v1427_v48, 0.0 }
 0x9b5   : > { %1432 = vadd.xlane.f32.xlu1 %v1431_v39  ;;  %v1948_v40 = vpop.f32.mrf.mxu0 }
 0x9b6   : > { %v1428_v41 = vadd.f32 %v1424_v38, %v2192_v4  ;;  %v2020_v4 = vld [vmem:[%s2396_s7 + $0x8] sm:$0xff]  }
 0x9b7   : > { %1950 = vmatpush3.bf16.msra.mxu1 %v2020_v4 }
 0x9b8   : > { %v1435_v42 = vsel %vm1434_vm8, %v1428_v41, 0.0  ;;  %1951 = vmatprep.subr.bf16.mxu1 %v2078_v1  ;;  %v1812_v1 = vld [vmem:[%s2399_s10] ss:$0 sm:$0xff] }
 0x9b9   : > { %1436 = vadd.xlane.f32.xlu0 %v1435_v42 }
 0x9bb   : > { %1952 = vmatpush3.bf16.msra.mxu1 %v2021_v54  ;;  %v1821_v54 = vld [vmem:[%s2400_s11] ss:$0 sm:$0xff] }
 0xa3e   : > { %v1433_v43 = vpop.xlane.xlu1 %1432 }
 0xa3f   : > { %v1439_v44 = vmul.f32 0.03125, %v1433_v43 }
 0xa41   : > { %v1441_v45 = vsub.f32 %v1427_v48, %v1439_v44 }
 0xa42   : > { %v1437_v46 = vpop.xlane.xlu0 %1436 }
 0xa43   : > { %v1440_v49 = vmul.f32 0.03125, %v1437_v46  ;;  %v1443_v50 = vmul.f32 %v1441_v45, %v1441_v45 }
 0xa45   : > { %v1442_v51 = vsub.f32 %v1428_v41, %v1440_v49  ;;  %v1445_v3 = vsel %vm468_vm1, %v1443_v50, 0.0 }
 0xa46   : > { %1446 = vadd.xlane.f32.xlu0 %v1445_v3 }
 0xa47   : > { %v1444_v52 = vmul.f32 %v1442_v51, %v1442_v51 }
 0xa49   : > { %v1448_v53 = vsel %vm1434_vm8, %v1444_v52, 0.0 }
 0xa4a   : > { %1449 = vadd.xlane.f32.xlu1 %v1448_v53 }
 0xacf   : > { %v1447_v60 = vpop.xlane.xlu0 %1446 }
 0xad0   : > { %v1451_v61 = vmul.f32 0.03125, %v1447_v60 }
 0xad2   : > { %v1453_v62 = vadd.f32 1e-05, %v1451_v61 }
 0xad3   : > { %v1450_v11 = vpop.xlane.xlu1 %1449 }
 0xad4   : > { %2062 = vrsqrt.f32 %v1453_v62  ;;  %v1452_v63 = vmul.f32 0.03125, %v1450_v11 }
 0xad6   : > { %v1454_v0 = vadd.f32 1e-05, %v1452_v63 }
 0xad8   : > { %2064 = vrsqrt.f32 %v1454_v0 }
 0xae1   : > { %v2063_v2 = vpop.eup %2062 }
 0xae2   : > { %v1457_v5 = vmul.f32 %v2063_v2, %v1441_v45 }
 0xae4   : > { %v1465_v10 = vmul.f32 %v1806_v6, %v1457_v5 }
 0xae5   : > { %v2065_v7 = vpop.eup %2064 }
 0xae6   : > { %v1458_v9 = vmul.f32 %v2065_v7, %v1442_v51  ;;  %v1473_v8 = vadd.f32 %v1807_v12, %v1465_v10 }
 0xae8   : > { %v1466_v13 = vmul.f32 %v1806_v6, %v1458_v9 }
 0xaea   : > { %v1474_v14 = vadd.f32 %v1807_v12, %v1466_v13 }
 0xaec   : > { %v1475_v15 = vpack.c.bf16 %v1474_v14, %v1473_v8 }
 0xaee   : > { %1954 = vmatmul.mubr.msk.bf16.vlgmr.msra.gmra.mxu1 %vm468_vm1, %v1475_v15 }
 0xbae   : > { %v1536_v20 = vpop.f32.mrf.mxu1 }
 0xbaf   : > { %v1537_v22 = vadd.f32 %v1808_v19, %v1536_v20 }
 0xbb0   : > { %v1955_v21 = vpop.f32.mrf.mxu1 }
 0xbb1   : > { %v1543_v26 = vmax.f32 %v1537_v22, 0.0 }
 0xbb2   : > { %v1539_v23 = vpop.f32.mrf.mxu1 }
 0xbb3   : > { %v1540_v24 = vadd.f32 %v1808_v19, %v1539_v23 }
 0xbb4   : > { %v1956_v25 = vpop.f32.mrf.mxu1 }
 0xbb5   : > { %v1544_v27 = vmax.f32 %v1540_v24, 0.0 }
 0xbb7   : > { %v1545_v28 = vpack.c.bf16 %v1544_v27, %v1543_v26 }
 0xbb9   : > { %1974 = vmatmul.mubr.bf16.vlgmr.msra.gmra.mxu0 %v1545_v28 }
 0xc79   : > { %v1651_v29 = vpop.f32.mrf.mxu0 }
 0xc7a   : > { %v1652_v30 = vadd.f32 %v1812_v1, %v1651_v29 }
 0xc7b   : > { %v1975_v31 = vpop.f32.mrf.mxu0 }
 0xc7c   : > { %v1658_v32 = vadd.f32 %v1652_v30, %v1473_v8 }
 0xc7d   : > { %v1654_v33 = vpop.f32.mrf.mxu0 }
 0xc7e   : > { %v1655_v34 = vadd.f32 %v1812_v1, %v1654_v33  ;;  %v1662_v47 = vsel %vm468_vm1, %v1658_v32, 0.0 }
 0xc7f   : > { %1663 = vadd.xlane.f32.xlu0 %v1662_v47  ;;  %v1976_v35 = vpop.f32.mrf.mxu0 }
 0xc80   : > { %v1659_v36 = vadd.f32 %v1655_v34, %v1474_v14 }
 0xc82   : > { %v1665_v48 = vsel %vm1434_vm8, %v1659_v36, 0.0 }
 0xc83   : > { %1666 = vadd.xlane.f32.xlu1 %v1665_v48 }
 0xd08   : > { %v1664_v37 = vpop.xlane.xlu0 %1663 }
 0xd09   : > { %v1668_v38 = vmul.f32 0.03125, %v1664_v37 }
 0xd0b   : > { %v1670_v39 = vsub.f32 %v1658_v32, %v1668_v38 }
 0xd0c   : > { %v1667_v40 = vpop.xlane.xlu1 %1666 }
 0xd0d   : > { %v1669_v41 = vmul.f32 0.03125, %v1667_v40  ;;  %v1672_v42 = vmul.f32 %v1670_v39, %v1670_v39 }
 0xd0f   : > { %v1671_v43 = vsub.f32 %v1659_v36, %v1669_v41  ;;  %v1674_v44 = vsel %vm468_vm1, %v1672_v42, 0.0 }
 0xd10   : > { %1675 = vadd.xlane.f32.xlu0 %v1674_v44 }
 0xd11   : > { %v1673_v45 = vmul.f32 %v1671_v43, %v1671_v43 }
 0xd13   : > { %v1677_v46 = vsel %vm1434_vm8, %v1673_v45, 0.0 }
 0xd14   : > { %1678 = vadd.xlane.f32.xlu1 %v1677_v46 }
 0xd99   : > { %v1676_v49 = vpop.xlane.xlu0 %1675 }
 0xd9a   : > { %v1680_v50 = vmul.f32 0.03125, %v1676_v49 }
 0xd9c   : > { %v1682_v51 = vadd.f32 1e-05, %v1680_v50 }
 0xd9d   : > { %v1679_v3 = vpop.xlane.xlu1 %1678 }
 0xd9e   : > { %2066 = vrsqrt.f32 %v1682_v51  ;;  %v1681_v52 = vmul.f32 0.03125, %v1679_v3 }
 0xda0   : > { %v1683_v53 = vadd.f32 1e-05, %v1681_v52 }
 0xda2   : > { %2068 = vrsqrt.f32 %v1683_v53 }
 0xdab   : > { %v2067_v4 = vpop.eup %2066 }
 0xdac   : > { %v1686_v55 = vmul.f32 %v2067_v4, %v1670_v39 }
 0xdae   : > { %v1694_v57 = vmul.f32 %v1821_v54, %v1686_v55 }
 0xdaf   : > { %v2069_v58 = vpop.eup %2068 }
 0xdb0   : > { %v1702_v59 = vadd.f32 %v1822_v56, %v1694_v57  ;;  %v1687_v60 = vmul.f32 %v2069_v58, %v1671_v43 }
 0xdb2   : > { %1704 = vst.msk [vmem:[%s440_s18] sm:$0xff] %vm468_vm1, %v1702_v59  ;;  %v1695_v61 = vmul.f32 %v1821_v54, %v1687_v60 }
 0xdb4   : > { %v1703_v62 = vadd.f32 %v1822_v56, %v1695_v61 }
 0xdb6   : > { %1705 = vst.msk [vmem:[%s440_s18 + $0x8] sm:$0x1] %vm1434_vm8, %v1703_v62 }
 0xdb7 PF: > { %s23_s25 = sadd.s32 1, %s2076_s25  }
 0xdb8   : > { %p20_p4 = scmp.ge.s32.totalorder %s23_s25, 4  }
 0xdba   :  { %22 = sbr.rel (!%p20_p4) target bundleno = 1 (0x1), region = 102 }

</bundles_post_ra>
